<compile_context>
chip_gen: v6e
topology: v6e:2x2x1
jax: 0.10.0
libtpu: 0.0.40
codegen_flags: <defaults>
</compile_context>

<pallas_src>
import jax
import jax.numpy as jnp
from jax.experimental import pallas as pl
from jax.experimental.pallas import tpu as pltpu

_LANE = 128
_SUBLANE = 8


def _round_up(x, m):
    return ((x + m - 1) // m) * m


def mlp_kernel(x_ref,
               w1_ref, b1_ref, w2_ref, b2_ref, w3_ref, b3_ref, w4_ref, b4_ref,
               w5_ref, b5_ref,
               out_ref,
               h_ref):
    """Fused 5-layer MLP; grid = (batch tile i, n_genes tile j)."""

    # Front layers (VMEM-resident small weights): compute once per batch tile.
    @pl.when(pl.program_id(1) == 0)
    def _():
        h = jnp.dot(x_ref[...].astype(jnp.bfloat16), w1_ref[...],
                    preferred_element_type=jnp.float32) + b1_ref[...]
        h = jnp.maximum(h, 0.0)
        h = jnp.dot(h.astype(jnp.bfloat16), w2_ref[...],
                    preferred_element_type=jnp.float32) + b2_ref[...]
        h = jnp.maximum(h, 0.0)
        h = jnp.dot(h.astype(jnp.bfloat16), w3_ref[...],
                    preferred_element_type=jnp.float32) + b3_ref[...]
        h = jnp.maximum(h, 0.0)
        h = jnp.dot(h.astype(jnp.bfloat16), w4_ref[...],
                    preferred_element_type=jnp.float32) + b4_ref[...]
        h_ref[...] = jnp.maximum(h, 0.0)

    # Last layer: W5 tile j streamed from HBM; h reused for every j.
    out = jnp.dot(h_ref[...].astype(jnp.bfloat16), w5_ref[...],
                  preferred_element_type=jnp.float32) + b5_ref[...]
    out_ref[...] = out.astype(out_ref.dtype)


def _prepare_params(params, tn):
    """Zero-pad PyTorch-shaped (in, out) weights to lane-dense shapes, cast to bf16.

    Zero padding is exact: zero rows/cols contribute nothing and ReLU(0) = 0."""
    dims = [params[0][0].shape[0]] + [w.shape[1] for w, _ in params]
    dims_p = [_round_up(d, _LANE) for d in dims[:-1]] + [_round_up(dims[-1], tn)]
    prepped = []
    for k, (w, b) in enumerate(params):
        d_in, d_out = w.shape
        p_in, p_out = dims_p[k], dims_p[k + 1]
        w_p = jnp.zeros((p_in, p_out), jnp.bfloat16).at[:d_in, :d_out].set(
            w.astype(jnp.bfloat16))
        b_p = jnp.zeros((1, p_out), jnp.float32).at[:, :d_out].set(
            jnp.reshape(b, (1, d_out)).astype(jnp.float32))
        prepped.append((w_p, b_p))
    return prepped, dims_p


def spot_position_mlp(x, params, *, tb=None, tn=512):
    """x: (batch, x_size) f32.  params: [(W, b)] with W (in, out), b (1, out), f32."""
    batch, x_size = x.shape
    n_genes = params[-1][0].shape[1]

    # Batch tile: fill the MXU M dimension (128) for large batches; for tiny
    # batches just round up to the 8-sublane granule (padding 8 -> 128 rows
    # would only inflate output write-back traffic, MXU cadence is unchanged).
    if tb is None:
        tb = min(128, _round_up(batch, _SUBLANE))
    tb = _round_up(tb, _SUBLANE)
    # n_genes tile: lane-dense multiple of 128 (unmasked vst stores).
    tn = _round_up(min(tn, _round_up(n_genes, _LANE)), _LANE)

    prepped, dims_p = _prepare_params(params, tn)
    xp = dims_p[0]
    d1, d2, d3, d4 = dims_p[1], dims_p[2], dims_p[3], dims_p[4]
    ngp = dims_p[-1]

    batch_p = _round_up(batch, tb)
    x_p = jnp.pad(x, ((0, batch_p - batch), (0, xp - x_size)))

    grid = (batch_p // tb, ngp // tn)

    def const(i, j):  # resident weights/biases: DMA'd once, stay in VMEM
        return (0, 0)

    in_specs = [
        pl.BlockSpec((tb, xp), lambda i, j: (i, 0)),        # x batch tile
        pl.BlockSpec((xp, d1), const), pl.BlockSpec((1, d1), const),
        pl.BlockSpec((d1, d2), const), pl.BlockSpec((1, d2), const),
        pl.BlockSpec((d2, d3), const), pl.BlockSpec((1, d3), const),
        pl.BlockSpec((d3, d4), const), pl.BlockSpec((1, d4), const),
        pl.BlockSpec((d4, tn), lambda i, j: (0, j)),        # W5 streamed over j
        pl.BlockSpec((1, tn), lambda i, j: (0, j)),         # b5 streamed over j
    ]
    out_specs = pl.BlockSpec((tb, tn), lambda i, j: (i, j))

    flat = [x_p]
    for w, b in prepped:
        flat += [w, b]

    out_p = pl.pallas_call(
        mlp_kernel,
        out_shape=jax.ShapeDtypeStruct((batch_p, ngp), jnp.float32),
        grid_spec=pltpu.PrefetchScalarGridSpec(
            num_scalar_prefetch=0,
            grid=grid,
            in_specs=in_specs,
            out_specs=out_specs,
            scratch_shapes=[pltpu.VMEM((tb, d4), jnp.float32)],  # h, reused across j
        ),
        compiler_params=pltpu.CompilerParams(
            # Batch tiles parallel (uses both v7x TensorCores); n_genes axis is
            # innermost/arbitrary so the h scratch is valid across j.
            dimension_semantics=("parallel", "arbitrary"),
            # Resident bf16 W1-4 (~0.6 MiB) + double-buffered W5/out tiles + h
            # scratch stay far below this; 32 MiB is safe on v5e/v6e/v7x.
            vmem_limit_bytes=32 * 1024 * 1024,
        ),
    )(*flat)

    return out_p[:batch, :n_genes]


def init_params(key, x_size, n_genes):
    """Deterministic init matching the PyTorch layer shapes (weights stored (in, out))."""
    dims = [x_size, 32, 64, 256, 1024, n_genes]
    params = []
    for i in range(len(dims) - 1):
        key, kw, kb = jax.random.split(key, 3)
        bound = 1.0 / float(dims[i]) ** 0.5
        w = jax.random.uniform(kw, (dims[i], dims[i + 1]), jnp.float32, -bound, bound)
        b = jax.random.uniform(kb, (1, dims[i + 1]), jnp.float32, -bound, bound)
        params.append((w, b))
    return params


def reference_mlp(x, params):
    """Pure-JAX reference emulating the kernel's mixed precision
    (bf16 matmul inputs, f32 accumulation, f32 bias add + ReLU)."""
    h = x
    for i, (w, b) in enumerate(params):
        h = jnp.dot(h.astype(jnp.bfloat16), w.astype(jnp.bfloat16),
                    preferred_element_type=jnp.float32) + b
        if i < len(params) - 1:
            h = jnp.maximum(h, 0.0)
    return h


if __name__ == "__main__":
    # Small demo shapes chosen to exercise BOTH grid axes:
    #   batch=24 with tb=8  -> 3 batch tiles (h scratch recomputed per tile)
    #   n_genes=500, tn=256 -> padded to 512, 2 streamed W5 / output tiles
    batch, x_size, n_genes = 24, 2, 500

    key = jax.random.PRNGKey(0)
    key, kx = jax.random.split(key)
    x = jax.random.normal(kx, (batch, x_size), jnp.float32)
    params = init_params(key, x_size, n_genes)

    out = spot_position_mlp(x, params, tb=8, tn=256)
    out = jax.block_until_ready(out)

    ref = reference_mlp(x, params)
    assert out.shape == (batch, n_genes)
    max_err = float(jnp.max(jnp.abs(out - ref)))
    assert jnp.allclose(out, ref, atol=2e-2, rtol=2e-2), (
        f"mismatch vs JAX reference, max abs err = {max_err}")

    print("KERNEL_OK")
</pallas_src>

<mosaic_0001>
module attributes {stable_mosaic.version = 11 : i64} {
  func.func @mlp_kernel(%arg0: i32, %arg1: i32, %arg2: memref<8x128xf32, #tpu.memory_space<vmem>>, %arg3: memref<128x128xbf16, #tpu.memory_space<vmem>>, %arg4: memref<1x128xf32, #tpu.memory_space<vmem>>, %arg5: memref<128x128xbf16, #tpu.memory_space<vmem>>, %arg6: memref<1x128xf32, #tpu.memory_space<vmem>>, %arg7: memref<128x256xbf16, #tpu.memory_space<vmem>>, %arg8: memref<1x256xf32, #tpu.memory_space<vmem>>, %arg9: memref<256x1024xbf16, #tpu.memory_space<vmem>>, %arg10: memref<1x1024xf32, #tpu.memory_space<vmem>>, %arg11: memref<1024x256xbf16, #tpu.memory_space<vmem>>, %arg12: memref<1x256xf32, #tpu.memory_space<vmem>>, %arg13: memref<8x256xf32, #tpu.memory_space<vmem>>, %arg14: memref<8x1024xf32, #tpu.memory_space<vmem>>) attributes {dimension_semantics = [#tpu.dimension_semantics<parallel>, #tpu.dimension_semantics<arbitrary>], iteration_bounds = array<i64: 3, 2>, scalar_prefetch = 0 : i64, scratch_operands = 1 : i64, tpu.core_type = #tpu.core_type<tc>, window_params = [{transform_indices = @transform_0, window_bounds = array<i64: 8, 128>}, {pipeline_mode = #tpu.pipeline_mode<synchronous>, transform_indices = @transform_1, window_bounds = array<i64: 128, 128>}, {pipeline_mode = #tpu.pipeline_mode<synchronous>, transform_indices = @transform_2, window_bounds = array<i64: 1, 128>}, {pipeline_mode = #tpu.pipeline_mode<synchronous>, transform_indices = @transform_3, window_bounds = array<i64: 128, 128>}, {pipeline_mode = #tpu.pipeline_mode<synchronous>, transform_indices = @transform_4, window_bounds = array<i64: 1, 128>}, {pipeline_mode = #tpu.pipeline_mode<synchronous>, transform_indices = @transform_5, window_bounds = array<i64: 128, 256>}, {pipeline_mode = #tpu.pipeline_mode<synchronous>, transform_indices = @transform_6, window_bounds = array<i64: 1, 256>}, {pipeline_mode = #tpu.pipeline_mode<synchronous>, transform_indices = @transform_7, window_bounds = array<i64: 256, 1024>}, {pipeline_mode = #tpu.pipeline_mode<synchronous>, transform_indices = @transform_8, window_bounds = array<i64: 1, 1024>}, {transform_indices = @transform_9, window_bounds = array<i64: 1024, 256>}, {transform_indices = @transform_10, window_bounds = array<i64: 1, 256>}, {transform_indices = @transform_11, window_bounds = array<i64: 8, 256>}]} {
    %c0_i32 = arith.constant 0 : i32
    %0 = arith.cmpi eq, %arg1, %c0_i32 : i32
    %1 = arith.extui %0 : i1 to i32
    %c0_i32_0 = arith.constant 0 : i32
    %2 = arith.cmpi ne, %1, %c0_i32_0 : i32
    scf.if %2 {
      %c0_8 = arith.constant 0 : index
      %c0_9 = arith.constant 0 : index
      %11 = vector.load %arg2[%c0_8, %c0_9] : memref<8x128xf32, #tpu.memory_space<vmem>>, vector<8x128xf32>
      %12 = arith.truncf %11 : vector<8x128xf32> to vector<8x128xbf16>
      %c0_10 = arith.constant 0 : index
      %c0_11 = arith.constant 0 : index
      %13 = vector.load %arg3[%c0_10, %c0_11] : memref<128x128xbf16, #tpu.memory_space<vmem>>, vector<128x128xbf16>
      %cst_12 = arith.constant dense<0.000000e+00> : vector<8x128xf32>
      %14 = tpu.matmul %12, %13, %cst_12 {dimension_numbers = #tpu.dot_dimension_numbers<[1], [0], [0], [1], [0, 0, 1, 1], [], []>} : vector<8x128xbf16>, vector<128x128xbf16>, vector<8x128xf32> -> vector<8x128xf32>
      %c0_13 = arith.constant 0 : index
      %c0_14 = arith.constant 0 : index
      %15 = vector.load %arg4[%c0_13, %c0_14] : memref<1x128xf32, #tpu.memory_space<vmem>>, vector<1x128xf32>
      %16 = vector.broadcast %15 : vector<1x128xf32> to vector<8x128xf32>
      %17 = arith.addf %14, %16 : vector<8x128xf32>
      %cst_15 = arith.constant 0.000000e+00 : f32
      %18 = vector.broadcast %cst_15 : f32 to vector<8x128xf32>
      %19 = arith.maximumf %17, %18 : vector<8x128xf32>
      %20 = arith.truncf %19 : vector<8x128xf32> to vector<8x128xbf16>
      %c0_16 = arith.constant 0 : index
      %c0_17 = arith.constant 0 : index
      %21 = vector.load %arg5[%c0_16, %c0_17] : memref<128x128xbf16, #tpu.memory_space<vmem>>, vector<128x128xbf16>
      %cst_18 = arith.constant dense<0.000000e+00> : vector<8x128xf32>
      %22 = tpu.matmul %20, %21, %cst_18 {dimension_numbers = #tpu.dot_dimension_numbers<[1], [0], [0], [1], [0, 0, 1, 1], [], []>} : vector<8x128xbf16>, vector<128x128xbf16>, vector<8x128xf32> -> vector<8x128xf32>
      %c0_19 = arith.constant 0 : index
      %c0_20 = arith.constant 0 : index
      %23 = vector.load %arg6[%c0_19, %c0_20] : memref<1x128xf32, #tpu.memory_space<vmem>>, vector<1x128xf32>
      %24 = vector.broadcast %23 : vector<1x128xf32> to vector<8x128xf32>
      %25 = arith.addf %22, %24 : vector<8x128xf32>
      %cst_21 = arith.constant 0.000000e+00 : f32
      %26 = vector.broadcast %cst_21 : f32 to vector<8x128xf32>
      %27 = arith.maximumf %25, %26 : vector<8x128xf32>
      %28 = arith.truncf %27 : vector<8x128xf32> to vector<8x128xbf16>
      %c0_22 = arith.constant 0 : index
      %c0_23 = arith.constant 0 : index
      %29 = vector.load %arg7[%c0_22, %c0_23] : memref<128x256xbf16, #tpu.memory_space<vmem>>, vector<128x256xbf16>
      %cst_24 = arith.constant dense<0.000000e+00> : vector<8x256xf32>
      %30 = tpu.matmul %28, %29, %cst_24 {dimension_numbers = #tpu.dot_dimension_numbers<[1], [0], [0], [1], [0, 0, 1, 1], [], []>} : vector<8x128xbf16>, vector<128x256xbf16>, vector<8x256xf32> -> vector<8x256xf32>
      %c0_25 = arith.constant 0 : index
      %c0_26 = arith.constant 0 : index
      %31 = vector.load %arg8[%c0_25, %c0_26] : memref<1x256xf32, #tpu.memory_space<vmem>>, vector<1x256xf32>
      %32 = vector.broadcast %31 : vector<1x256xf32> to vector<8x256xf32>
      %33 = arith.addf %30, %32 : vector<8x256xf32>
      %cst_27 = arith.constant 0.000000e+00 : f32
      %34 = vector.broadcast %cst_27 : f32 to vector<8x256xf32>
      %35 = arith.maximumf %33, %34 : vector<8x256xf32>
      %36 = arith.truncf %35 : vector<8x256xf32> to vector<8x256xbf16>
      %c0_28 = arith.constant 0 : index
      %c0_29 = arith.constant 0 : index
      %37 = vector.load %arg9[%c0_28, %c0_29] : memref<256x1024xbf16, #tpu.memory_space<vmem>>, vector<256x1024xbf16>
      %cst_30 = arith.constant dense<0.000000e+00> : vector<8x1024xf32>
      %38 = tpu.matmul %36, %37, %cst_30 {dimension_numbers = #tpu.dot_dimension_numbers<[1], [0], [0], [1], [0, 0, 1, 1], [], []>} : vector<8x256xbf16>, vector<256x1024xbf16>, vector<8x1024xf32> -> vector<8x1024xf32>
      %c0_31 = arith.constant 0 : index
      %c0_32 = arith.constant 0 : index
      %39 = vector.load %arg10[%c0_31, %c0_32] : memref<1x1024xf32, #tpu.memory_space<vmem>>, vector<1x1024xf32>
      %40 = vector.broadcast %39 : vector<1x1024xf32> to vector<8x1024xf32>
      %41 = arith.addf %38, %40 : vector<8x1024xf32>
      %cst_33 = arith.constant 0.000000e+00 : f32
      %42 = vector.broadcast %cst_33 : f32 to vector<8x1024xf32>
      %43 = arith.maximumf %41, %42 : vector<8x1024xf32>
      %c0_34 = arith.constant 0 : index
      %c0_35 = arith.constant 0 : index
      %44 = vector.load %arg14[%c0_34, %c0_35] : memref<8x1024xf32, #tpu.memory_space<vmem>>, vector<8x1024xf32>
      tpu.vector_store %arg14[%c0_34, %c0_35], %43 {strides = array<i32>} : memref<8x1024xf32, #tpu.memory_space<vmem>>, vector<8x1024xf32>,
    } else {
    }
    %c0 = arith.constant 0 : index
    %c0_1 = arith.constant 0 : index
    %3 = vector.load %arg14[%c0, %c0_1] : memref<8x1024xf32, #tpu.memory_space<vmem>>, vector<8x1024xf32>
    %4 = arith.truncf %3 : vector<8x1024xf32> to vector<8x1024xbf16>
    %c0_2 = arith.constant 0 : index
    %c0_3 = arith.constant 0 : index
    %5 = vector.load %arg11[%c0_2, %c0_3] : memref<1024x256xbf16, #tpu.memory_space<vmem>>, vector<1024x256xbf16>
    %cst = arith.constant dense<0.000000e+00> : vector<8x256xf32>
    %6 = tpu.matmul %4, %5, %cst {dimension_numbers = #tpu.dot_dimension_numbers<[1], [0], [0], [1], [0, 0, 1, 1], [], []>} : vector<8x1024xbf16>, vector<1024x256xbf16>, vector<8x256xf32> -> vector<8x256xf32>
    %c0_4 = arith.constant 0 : index
    %c0_5 = arith.constant 0 : index
    %7 = vector.load %arg12[%c0_4, %c0_5] : memref<1x256xf32, #tpu.memory_space<vmem>>, vector<1x256xf32>
    %8 = vector.broadcast %7 : vector<1x256xf32> to vector<8x256xf32>
    %9 = arith.addf %6, %8 : vector<8x256xf32>
    %c0_6 = arith.constant 0 : index
    %c0_7 = arith.constant 0 : index
    %10 = vector.load %arg13[%c0_6, %c0_7] : memref<8x256xf32, #tpu.memory_space<vmem>>, vector<8x256xf32>
    tpu.vector_store %arg13[%c0_6, %c0_7], %9 {strides = array<i32>} : memref<8x256xf32, #tpu.memory_space<vmem>>, vector<8x256xf32>,
    return
  }
  func.func @transform_0(%arg0: i32, %arg1: i32) -> (i32, i32) {
    %c0_i32 = arith.constant 0 : i32
    %c0_i32_0 = arith.constant 0 : i32
    return %arg0, %c0_i32 : i32, i32
  }
  func.func @transform_1(%arg0: i32, %arg1: i32) -> (i32, i32) {
    %c0_i32 = arith.constant 0 : i32
    %c0_i32_0 = arith.constant 0 : i32
    %c0_i32_1 = arith.constant 0 : i32
    return %c0_i32, %c0_i32_0 : i32, i32
  }
  func.func @transform_2(%arg0: i32, %arg1: i32) -> (i32, i32) {
    %c0_i32 = arith.constant 0 : i32
    %c0_i32_0 = arith.constant 0 : i32
    %c0_i32_1 = arith.constant 0 : i32
    return %c0_i32, %c0_i32_0 : i32, i32
  }
  func.func @transform_3(%arg0: i32, %arg1: i32) -> (i32, i32) {
    %c0_i32 = arith.constant 0 : i32
    %c0_i32_0 = arith.constant 0 : i32
    %c0_i32_1 = arith.constant 0 : i32
    return %c0_i32, %c0_i32_0 : i32, i32
  }
  func.func @transform_4(%arg0: i32, %arg1: i32) -> (i32, i32) {
    %c0_i32 = arith.constant 0 : i32
    %c0_i32_0 = arith.constant 0 : i32
    %c0_i32_1 = arith.constant 0 : i32
    return %c0_i32, %c0_i32_0 : i32, i32
  }
  func.func @transform_5(%arg0: i32, %arg1: i32) -> (i32, i32) {
    %c0_i32 = arith.constant 0 : i32
    %c0_i32_0 = arith.constant 0 : i32
    %c0_i32_1 = arith.constant 0 : i32
    return %c0_i32, %c0_i32_0 : i32, i32
  }
  func.func @transform_6(%arg0: i32, %arg1: i32) -> (i32, i32) {
    %c0_i32 = arith.constant 0 : i32
    %c0_i32_0 = arith.constant 0 : i32
    %c0_i32_1 = arith.constant 0 : i32
    return %c0_i32, %c0_i32_0 : i32, i32
  }
  func.func @transform_7(%arg0: i32, %arg1: i32) -> (i32, i32) {
    %c0_i32 = arith.constant 0 : i32
    %c0_i32_0 = arith.constant 0 : i32
    %c0_i32_1 = arith.constant 0 : i32
    return %c0_i32, %c0_i32_0 : i32, i32
  }
  func.func @transform_8(%arg0: i32, %arg1: i32) -> (i32, i32) {
    %c0_i32 = arith.constant 0 : i32
    %c0_i32_0 = arith.constant 0 : i32
    %c0_i32_1 = arith.constant 0 : i32
    return %c0_i32, %c0_i32_0 : i32, i32
  }
  func.func @transform_9(%arg0: i32, %arg1: i32) -> (i32, i32) {
    %c0_i32 = arith.constant 0 : i32
    %c0_i32_0 = arith.constant 0 : i32
    return %c0_i32, %arg1 : i32, i32
  }
  func.func @transform_10(%arg0: i32, %arg1: i32) -> (i32, i32) {
    %c0_i32 = arith.constant 0 : i32
    %c0_i32_0 = arith.constant 0 : i32
    return %c0_i32, %arg1 : i32, i32
  }
  func.func @transform_11(%arg0: i32, %arg1: i32) -> (i32, i32) {
    %c0_i32 = arith.constant 0 : i32
    return %arg0, %arg1 : i32, i32
  }
}

</mosaic_0001>

<bundles_post_ra>
// kernel: tpu_custom_call.1
= control target key start
LH: loop header
LB: loop body
LE: loop exit
PB: predicated region body
PF: predicated region fallthrough
CT: control target
= control target key end

     0   :  { %s4913_s0 = inlined_call_operand.hbm [shape: f32[24,128], index: 0, kind: input, shape index: {}]   ;;  %s4914_s1 = inlined_call_operand.hbm [shape: bf16[128,128], index: 1, kind: input, shape index: {}]   ;;  %s4915_s2 = inlined_call_operand.hbm [shape: f32[1,128], index: 2, kind: input, shape index: {}]   ;;  %s4916_s3 = inlined_call_operand.hbm [shape: bf16[128,128], index: 3, kind: input, shape index: {}]   ;;  %s4917_s4 = inlined_call_operand.hbm [shape: f32[1,128], index: 4, kind: input, shape index: {}]   ;;  %s4918_s5 = inlined_call_operand.hbm [shape: bf16[128,256], index: 5, kind: input, shape index: {}]   ;;  %s4919_s6 = inlined_call_operand.vmem [shape: f32[1,256], index: 6, kind: input, shape index: {}]   ;;  %s4920_s7 = inlined_call_operand.hbm [shape: bf16[256,1024], index: 7, kind: input, shape index: {}]   ;;  %s4921_s8 = inlined_call_operand.vmem [shape: f32[1,1024], index: 8, kind: input, shape index: {}]   ;;  %s4922_s9 = inlined_call_operand.hbm [shape: bf16[1024,512], index: 9, kind: input, shape index: {}]   ;;  %s4923_s10 = inlined_call_operand.vmem [shape: f32[1,512], index: 10, kind: input, shape index: {}]   ;;  %s4924_s11 = inlined_call_operand.hbm [shape: f32[24,512], index: 11, kind: output, shape index: {}]  }
   0x1   :  { %4941 = sst [smem:[#allocation34_spill]] %s4913_s0 }
   0x2   :  { %4942 = sst [smem:[#allocation35_spill]] %s4914_s1 }
   0x3   :  { %4943 = sst [smem:[#allocation36_spill]] %s4915_s2 }
   0x4   :  { %4944 = sst [smem:[#allocation37_spill]] %s4916_s3 }
   0x5   :  { %4945 = sst [smem:[#allocation38_spill]] %s4917_s4 }
   0x6   :  { %4946 = sst [smem:[#allocation39_spill]] %s4918_s5 }
   0x7   :  { %4947 = sst [smem:[#allocation40_spill]] %s4919_s6 }
   0x8   :  { %4948 = sst [smem:[#allocation41_spill]] %s4920_s7 }
   0x9   :  { %4949 = sst [smem:[#allocation42_spill]] %s4921_s8 }
   0xa   :  { %4950 = sst [smem:[#allocation43_spill]] %s4922_s9 }
   0xb   :  { %4951 = sst [smem:[#allocation44_spill]] %s4923_s10 }
   0xc   :  { %4952 = sst [smem:[#allocation45_spill]] %s4924_s11 }
   0xd   :  { %16 = vsyncpa [#allocation4], 0 }
   0xe   :  { %18 = vsyncpa [#allocation4 + $0x1], 0 }
   0xf   :  { %19 = vsyncpa [#allocation7], 0 }
  0x10   :  { %20 = vsyncpa [#allocation10], 0 }
  0x11   :  { %21 = vsyncpa [#allocation13], 0 }
  0x12   :  { %22 = vsyncpa [#allocation16], 0 }
  0x13   :  { %24 = vsyncpa [#allocation16 + $0x1], 0 }
  0x14   :  { %25 = vsyncpa [#allocation5], 0 }
  0x15   :  { %27 = vsyncpa [#allocation5 + $0x1], 0  ;;  %s4357_s17 = smov 0   ;;  %s4359_s18 = smov 0  }
  0x16   :  { %s4361_s19 = smov 0   ;;  %s4363_s20 = smov 0  }
  0x17   :  { %s4365_s21 = smov 0   ;;  %s4367_s22 = smov 0  }
  0x18   :  { %s4369_s23 = smov 0   ;;  %s4371_s24 = smov 0  }
  0x19   :  { %s4373_s25 = smov 0   ;;  %s4375_s26 = smov 0  }
  0x1a   :  { %s4377_s27 = smov 0   ;;  %s4379_s28 = smov 0  }
  0x1b   :  { %s4381_s29 = smov 0   ;;  %s4383_s30 = smov 0  }
  0x1c LB: > { %4953 = sst [smem:[#allocation24_spill]] %s4244_s22  ;;  %s4926_s12 = sadd.s32 4294967295, %s4276_s30   ;;  %s4276_s30 = sphi %s4383_s30, %s33_s30   ;;  %s4272_s29 = sphi %s4381_s29, %s5007_s29   ;;  %s4268_s28 = sphi %s4379_s28, %s5016_s28   ;;  %s4264_s27 = sphi %s4377_s27, %s5005_s27   ;;  %s4260_s26 = sphi %s4375_s26, %s5015_s26   ;;  %s4256_s25 = sphi %s4373_s25, %s5004_s25   ;;  %s4252_s24 = sphi %s4371_s24, %s5014_s24   ;;  %s4248_s23 = sphi %s4369_s23, %s5013_s23   ;;  %s4244_s22 = sphi %s4367_s22, %s5002_s22   ;;  %s4240_s21 = sphi %s4365_s21, %s5012_s21   ;;  %s4236_s20 = sphi %s4363_s20, %s5011_s20   ;;  %s4232_s19 = sphi %s4361_s19, %s5010_s19   ;;  %s4228_s18 = sphi %s4359_s18, %s5009_s18   ;;  %s4224_s17 = sphi %s4357_s17, %s5008_s17  }
  0x1d   : > { %4954 = sst [smem:[#allocation25_spill]] %s4256_s25  ;;  %p3090_p0 = scmp.ge.s32.totalorder %s4276_s30, 1 }
  0x1e   : > { %4955 = sst [smem:[#allocation26_spill]] %s4260_s26  ;;  %p4431_p1 = scmp.eq.s32.totalorder %s4926_s12, 0 }
  0x1f   : > { %4956 = sst [smem:[#allocation27_spill]] %s4264_s27  ;;  %p324_p2 = scmp.lt.s32.totalorder %s4276_s30, 7 }
  0x20   : > { %4957 = sst [smem:[#allocation28_spill]] %s4272_s29  ;;  %s4278_s15 = smov [#allocation6]  }
  0x21   : > { %s4958_s13 = scalar_select %p4431_p1, 1, 0 }
  0x22   : > { %p4436_p3 = pnand %p3090_p0, %p324_p2  ;;  %s336_s16 = sshll.u32 %s4278_s15, 4  ;;  %s337_s16 = int_to_ptr.vmem [resolvable:$true] %s336_s16 }
  0x23   : > { %s4279_s12 = smov [#allocation9]   ;;  %s4280_s8 = smov [#allocation12]  }
  0x24   : > { %s4959_s14 = scalar_select %p4436_p3, 1, 0 }
  0x25   : > { %p3500_p4 = pneg %p4436_p3  ;;  %s360_s27 = sshll.u32 %s4279_s12, 4  ;;  %s361_s27 = int_to_ptr.vmem [resolvable:$true] %s360_s27 }
  0x26   : > { %4960 = sst [smem:[#allocation29_spill]] %s4959_s14  ;;  %s384_s6 = sshll.u32 %s4280_s8, 4  ;;  %s385_s6 = int_to_ptr.vmem [resolvable:$true] %s384_s6 }
  0x27   : > { %p4444_p5 = pnand %p3500_p4, %p4431_p1  ;;  %s3915_s15 = scalar_lea.vmem %s337_s16, 1024 }
  0x28   : > { %p3916_p7 = scmp.ne.s32.totalorder %s337_s16, %s3915_s15  ;;  %p3923_p10 = scmp.lt.s32.totalorder %s337_s16, %s337_s16 }
  0x29   : > { %p4450_p6 = pneg %p4444_p5  ;;  %p3924_p11 = scmp.lt.s32.totalorder %s3915_s15, %s3915_s15 }
  0x2b   : > { %p3918_p8 = pnand %p3916_p7, %p4450_p6  ;;  %p3925_p12 = por %p3924_p11, %p3923_p10 }
  0x2d   : > { %p3919_p9 = pneg %p3918_p8 }
  0x2f   : > { %p3926_p13 = pnand %p3925_p12, %p3919_p9 }
  0x31   : > { %3929 = shalt.err (!%p3926_p13)
}
  0x32   : > { %s4281_s12 = smov 64   ;;  %s4282_s8 = smov 4  }
  0x33   : > { %s4963_s1 = sld [smem:[#allocation35_spill]]  ;;  %s3941_s9 = scalar_lea.vmem %s361_s27, 1024 }
  0x34   : > { %p3942_p0 = scmp.ne.s32.totalorder %s361_s27, %s3941_s9  ;;  %p3949_p7 = scmp.lt.s32.totalorder %s361_s27, %s361_s27 }
  0x35   : > { %p3950_p8 = scmp.lt.s32.totalorder %s3941_s9, %s3941_s9 }
  0x36   : > { %p3944_p2 = pnand %p3942_p0, %p4450_p6 }
  0x37   : > { %p3951_p3 = por %p3950_p8, %p3949_p7 }
  0x38   : > { %p3945_p4 = pneg %p3944_p2 }
  0x39   : > { %3503 = dma.hbm_to_vmem [thread:$0]  (!%p4444_p5), %s4963_s1, 1024, %s337_s16, [#allocation7], %s4281_s12, %s4281_s12, %s4282_s8  }
  0x3a   : > { %p3952_p10 = pnand %p3951_p3, %p3945_p4 }
  0x3c   : > { %3955 = shalt.err (!%p3952_p10)
}
  0x3d   : > { %s4964_s3 = sld [smem:[#allocation37_spill]]  ;;  %s3967_s26 = scalar_lea.vmem %s385_s6, 2048 }
  0x3e   : > { %p3968_p9 = scmp.ne.s32.totalorder %s385_s6, %s3967_s26  ;;  %p3975_p13 = scmp.lt.s32.totalorder %s385_s6, %s385_s6 }
  0x3f   : > { %p3976_p0 = scmp.lt.s32.totalorder %s3967_s26, %s3967_s26 }
  0x40   : > { %p3970_p11 = pnand %p3968_p9, %p4450_p6 }
  0x41   : > { %p3977_p2 = por %p3976_p0, %p3975_p13 }
  0x42   : > { %p3971_p12 = pneg %p3970_p11 }
  0x43   : > { %3509 = dma.hbm_to_vmem [thread:$0]  (!%p4444_p5), %s4964_s3, 1024, %s361_s27, [#allocation10], %s4281_s12, %s4281_s12, %s4282_s8  }
  0x44   : > { %p3978_p1 = pnand %p3977_p2, %p3971_p12 }
  0x46   : > { %3981 = shalt.err (!%p3978_p1)
}
  0x47   : > { %s4933_s9 = smov 128   ;;  %s4934_s14 = smov 8  }
  0x48   : > { %s4965_s5 = sld [smem:[#allocation39_spill]]  ;;  %s4285_s16 = smov [#allocation8]  }
  0x49   : > { %s350_s12 = sshll.u32 %s4285_s16, 4  ;;  %s4286_s8 = smov [#allocation11]   ;;  %s351_s12 = int_to_ptr.vmem [resolvable:$true] %s350_s12 }
  0x4a   : > { %s374_s15 = sshll.u32 %s4286_s8, 4  ;;  %s3993_s26 = scalar_lea.vmem %s351_s12, 16  ;;  %s375_s15 = int_to_ptr.vmem [resolvable:$true] %s374_s15 }
  0x4b   : > { %p3994_p3 = scmp.ne.s32.totalorder %s351_s12, %s3993_s26  ;;  %s4000_s1 = scalar_lea.vmem %s351_s12, 32 }
  0x4c   : > { %p4001_p7 = scmp.lt.s32.totalorder %s351_s12, %s351_s12  ;;  %p4002_p8 = scmp.lt.s32.totalorder %s4000_s1, %s3993_s26 }
  0x4d   : > { %p3996_p1 = pnand %p3994_p3, %p4450_p6 }
  0x4e   : > { %3515 = dma.hbm_to_vmem [thread:$0]  (!%p4444_p5), %s4965_s5, 2048, %s385_s6, [#allocation13], %s4933_s9, %s4933_s9, %s4934_s14  }
  0x4f   : > { %p3997_p4 = pneg %p3996_p1  ;;  %p4003_p10 = por %p4002_p8, %p4001_p7 }
  0x51   : > { %p4004_p9 = pnand %p4003_p10, %p3997_p4 }
  0x53   : > { %4007 = shalt.err (!%p4004_p9)
}
  0x54   : > { %s4966_s2 = sld [smem:[#allocation36_spill]]  ;;  %s4019_s27 = scalar_lea.vmem %s375_s15, 16 }
  0x55   : > { %p4020_p11 = scmp.ne.s32.totalorder %s375_s15, %s4019_s27  ;;  %s4026_s16 = scalar_lea.vmem %s375_s15, 32 }
  0x56   : > { %p4027_p0 = scmp.lt.s32.totalorder %s375_s15, %s375_s15  ;;  %p4028_p2 = scmp.lt.s32.totalorder %s4026_s16, %s4019_s27 }
  0x57   : > { %p4022_p12 = pnand %p4020_p11, %p4450_p6 }
  0x58   : > { %p4029_p3 = por %p4028_p2, %p4027_p0 }
  0x59   : > { %p4023_p13 = pneg %p4022_p12 }
  0x5a   : > { %3506 = dma.hbm_to_vmem [thread:$0]  (!%p4444_p5), %s4966_s2, 16, %s351_s12, [#allocation7]  }
  0x5b   : > { %p4030_p1 = pnand %p4029_p3, %p4023_p13 }
  0x5d   : > { %4033 = shalt.err (!%p4030_p1)
}
  0x5e   : > { %s4967_s4 = sld [smem:[#allocation38_spill]]  ;;  %s4287_s12 = smov [#allocation14]  }
  0x5f   : > { %s400_s26 = sshll.u32 %s4287_s12, 4  ;;  %s401_s26 = int_to_ptr.vmem [resolvable:$true] %s400_s26 }
  0x60   : > { %s4045_s0 = scalar_lea.vmem %s401_s26, 16384  ;;  %p4053_p10 = scmp.lt.s32.totalorder %s401_s26, %s401_s26 }
  0x61   : > { %p4046_p4 = scmp.ne.s32.totalorder %s401_s26, %s4045_s0  ;;  %p4054_p9 = scmp.lt.s32.totalorder %s4045_s0, %s4045_s0 }
  0x63   : > { %p4048_p7 = pnand %p4046_p4, %p4450_p6  ;;  %p4055_p11 = por %p4054_p9, %p4053_p10 }
  0x64   : > { %3512 = dma.hbm_to_vmem [thread:$0]  (!%p4444_p5), %s4967_s4, 16, %s375_s15, [#allocation10]  }
  0x65   : > { %p4049_p8 = pneg %p4048_p7 }
  0x67   : > { %p4056_p12 = pnand %p4055_p11, %p4049_p8 }
  0x69   : > { %4059 = shalt.err (!%p4056_p12)
}
  0x6a   : > { %s4288_s6 = smov 512   ;;  %s4289_s10 = smov 32  }
  0x6b   : > { %s4968_s7 = sld [smem:[#allocation41_spill]]  ;;  %s42_s1 = sadd.s32 1, %s4268_s28 }
  0x6c   : > { %p43_p6 = scmp.ge.s32.totalorder %s42_s1, 2  ;;  %s45_s8 = sadd.s32 1, %s4272_s29 }
  0x6d   : > { %s52_s12 = sadd.s32 1, %s4256_s25  ;;  %p59_p13 = scmp.ne.s32.totalorder %s4256_s25, %s4252_s24 }
  0x6e   : > { %s5018_s1 = smov (%p43_p6, %s42_s1), 0  ;;  %s5020_s8 = smov (!%p43_p6, %s45_s8), %s4272_s29 }
  0x6f   : > { %4969 = sst [smem:[#allocation30_spill]] %s5018_s1  ;;  %p65_p0 = scmp.ne.s32.totalorder %s4252_s24, %s4248_s23 }
  0x70   : > { %p47_p2 = scmp.ge.s32.totalorder %s5020_s8, 3  ;;  %s243_s11 = ssub.s32 %s4268_s28, %s5018_s1 }
  0x71   : > { %3518 = dma.hbm_to_vmem [thread:$0]  (!%p4444_p5), %s4968_s7, 16384, %s401_s26, [#allocation13], %s4288_s6, %s4288_s6, %s4289_s10  }
  0x72   : > { %p60_p5 = scmp.eq.s32.totalorder %s4276_s30, 0  ;;  %p4971_p1 = scmp.ne.s32.totalorder %s4958_s13, 0 }
  0x73   : > { %s5022_s8 = smov (%p47_p2, %s5020_s8), 0  ;;  %p244_p7 = scmp.eq.s32.totalorder %s243_s11, 0 }
  0x74   : > { %p4515_p3 = por %p60_p5, %p59_p13  ;;  %p4521_p4 = por %p4971_p1, %p65_p0 }
  0x75   : > { %4973 = sst [smem:[#allocation31_spill]] %s5022_s8  ;;  %s246_s23 = sadd.s32 1, %s4244_s22 }
  0x76   : > { %s49_s6 = ssub.s32 %s4272_s29, %s5022_s8  ;;  %p253_p8 = scmp.ne.s32.totalorder %s4244_s22, %s4240_s21 }
  0x77   : > { %p50_p10 = scmp.eq.s32.totalorder %s49_s6, 0  ;;  %p259_p9 = scmp.ne.s32.totalorder %s4240_s21, %s4236_s20 }
  0x78   : > { %s4535_s10 = scalar_select %p244_p7, %s4244_s22, %s246_s23  }
  0x79   : > { %s4538_s15 = scalar_select %p50_p10, %s4256_s25, %s52_s12  }
  0x7a   : > { %4974 = sst [smem:[#allocation32_spill]] %s4535_s10  ;;  %p4542_p11 = por %p253_p8, %p60_p5 }
  0x7b   : > { %4975 = sst [smem:[#allocation33_spill]] %s4538_s15  ;;  %p4548_p12 = por %p259_p9, %p4971_p1 }
  0x7c   : > { %s297_s14 = sor.u32 %s243_s11, %s49_s6  ;;  %s300_s16 = sadd.s32 1, %s4232_s19 }
  0x7d   : > { %p298_p6 = scmp.eq.s32.totalorder %s297_s14, 0  ;;  %p310_p13 = scmp.ne.s32.totalorder %s4232_s19, %s4228_s18 }
  0x7e   : > { %s4978_s20 = sadd.s32 4294967295, %s4276_s30   ;;  %p316_p2 = scmp.ne.s32.totalorder %s4228_s18, %s4224_s17 }
  0x7f   : > { %p311_p0 = scmp.eq.s32.totalorder %s4978_s20, 5  ;;  %s4980_s2 = sadd.s32 4294967294, %s4276_s30  }
  0x80   : > { %s4560_s12 = scalar_select %p298_p6, %s4232_s19, %s300_s16  }
  0x81   : > { %p4562_p5 = por %p311_p0, %p310_p13  ;;  %p317_p1 = scmp.eq.s32.totalorder %s4980_s2, 5 }
  0x82   : > { %p3536_p7 = scmp.lt.s32.totalorder %s4276_s30, 6  ;;  %s417_s3 = sand.u32 1, %s4256_s25  }
  0x83   : > { %s4979_s23 = scalar_select %p4562_p5, 1, 0 }
  0x84   : > { %p4570_p8 = por %p317_p1, %p316_p2  ;;  %s3098_s14 = sshll.u32 %s417_s3, 3 }
  0x85   : > { %s3099_s6 = sshll.u32 %s4272_s29, 7  ;;  %s4982_s5 = sld [smem:[#allocation34_spill]] }
  0x86   : > { %s4981_s11 = scalar_select %p4570_p8, 1, 0 }
  0x87   : > { %s421_s16 = scalar_lea.vmem [#allocation3], %s3098_s14  ;;  %p4580_p10 = pnand %p3536_p7, %p4515_p3 }
  0x88   : > { %s428_s8 = sshll.u32 %s421_s16, 4  ;;  %p4586_p9 = pnand %p3536_p7, %p4542_p11  ;;  %s429_s8 = int_to_ptr.vmem [resolvable:$true] %s428_s8 }
  0x89   : > { %s435_s15 = sand.u32 1, %s4244_s22   ;;  %s418_s29 = scalar_lea.sflag [#allocation4], %s417_s3 }
  0x8a   : > { %p4062_p6 = pneg %p4580_p10  ;;  %s4073_s4 = scalar_lea.vmem %s429_s8, 128 }
  0x8b   : > { %s426_s7 = scalar_lea.hbm %s4982_s5, %s3099_s6  ;;  %p4074_p13 = scmp.ne.s32.totalorder %s429_s8, %s4073_s4 }
  0x8c   : > { %s4290_s5 = smov [#allocation3]  }
  0x8d   : > { %p4076_p0 = pnand %p4074_p13, %p4062_p6  ;;  %s4078_s26 = sshll.u32 %s4290_s5, 4  ;;  %s4079_s26 = int_to_ptr.vmem [resolvable:$false] %s4078_s26 }
  0x8e   : > { %s4080_s14 = scalar_lea.vmem %s4079_s26, 256  ;;  %p4081_p3 = scmp.lt.s32.totalorder %s429_s8, %s4079_s26 }
  0x8f   : > { %p4077_p2 = pneg %p4076_p0  ;;  %p4082_p1 = scmp.lt.s32.totalorder %s4080_s14, %s4073_s4 }
  0x91   : > { %p4083_p8 = por %p4082_p1, %p4081_p3 }
  0x93   : > { %p4084_p5 = pnand %p4083_p8, %p4077_p2 }
  0x95   : > { %4087 = shalt.err (!%p4084_p5)
}
  0x96   : > { %3522 = dma.hbm_to_vmem [thread:$0]  (!%p4580_p10), %s426_s7, 128, %s429_s8, %s418_s29  }
  0x97   : > { %s3100_s3 = sshll.u32 %s435_s15, 10  ;;  %s3411_s27 = sshll.u32 %s4268_s28, 7 }
  0x98   : > { %s4985_s16 = sld [smem:[#allocation43_spill]]  ;;  %s439_s10 = scalar_lea.vmem [#allocation15], %s3100_s3 }
  0x99   : > { %s446_s5 = sshll.u32 %s439_s10, 4  ;;  %s436_s22 = scalar_lea.sflag [#allocation16], %s435_s15  ;;  %s447_s5 = int_to_ptr.vmem [resolvable:$true] %s446_s5 }
  0x9a   : > { %p4090_p11 = pneg %p4586_p9  ;;  %s4101_s4 = scalar_lea.vmem %s447_s5, 16384 }
  0x9b   : > { %p4102_p7 = scmp.ne.s32.totalorder %s447_s5, %s4101_s4  ;;  %s4291_s1 = smov [#allocation15]  }
  0x9c   : > { %s4106_s26 = sshll.u32 %s4291_s1, 4  ;;  %s4107_s26 = int_to_ptr.vmem [resolvable:$false] %s4106_s26 }
  0x9d   : > { %p4104_p5 = pnand %p4102_p7, %p4090_p11  ;;  %s4108_s7 = scalar_lea.vmem %s4107_s26, 32768 }
  0x9e   : > { %s445_s25 = scalar_lea.hbm %s4985_s16, %s3411_s27  ;;  %p4109_p10 = scmp.lt.s32.totalorder %s447_s5, %s4107_s26 }
  0x9f   : > { %p4105_p8 = pneg %p4104_p5  ;;  %p4110_p6 = scmp.lt.s32.totalorder %s4108_s7, %s4101_s4 }
  0xa1   : > { %p4111_p13 = por %p4110_p6, %p4109_p10 }
  0xa3   : > { %p4112_p0 = pnand %p4111_p13, %p4105_p8 }
  0xa5   : > { %4115 = shalt.err (!%p4112_p0)
}
  0xa6   : > { %s4292_s29 = smov 256   ;;  %s4986_s8 = smov 8  }
  0xa7   : > { %s4987_s10 = smov 128   ;;  %s4988_s15 = sld [smem:[#allocation29_spill]] }
  0xa8   : > { %3525 = dma.hbm_to_vmem [thread:$0]  (!%p4586_p9), %s445_s25, 16384, %s447_s5, %s436_s22, %s4292_s29, %s4987_s10, %s4986_s8  }
  0xad   : > { %p4989_p2 = scmp.ne.s32.totalorder %s4988_s15, 0 }
  0xae   : > { %s468_s14 = sand.u32 (!%p4989_p2), 1, %s4252_s24  }
  0xaf   : > { %466 = sbr.rel (%p4989_p2) target bundleno = 1443 (0x5a3), region = 64  ;;  %s4608_s3 = sshll.u32 (!%p4989_p2), %s468_s14, 3 }
  0xb0   : > { %s469_s27 = scalar_lea.sflag (!%p4989_p2), [#allocation4], %s468_s14  ;;  %s472_s6 = scalar_lea.vmem (!%p4989_p2), [#allocation3], %s4608_s3 }
  0xb4   : > { %4199 = dma.done.wait (%p4521_p4), %s469_s27, 128  }
  0xb5   : > { %4201 = vsyncadd (%p4521_p4), %s469_s27, 4294967168  ;;  %p4990_p3 = scmp.ne.s32.totalorder %s4958_s13, 0 }
  0xb7   : > { %4203 = dma.done.wait (%p4990_p3), [#allocation7], 1040  }
  0xb8   : > { %4205 = vsyncadd (%p4990_p3), [#allocation7], 4294966256 }
  0xb9   : > { %4207 = dma.done.wait (%p4990_p3), [#allocation10], 1040  }
  0xba   : > { %4209 = vsyncadd (%p4990_p3), [#allocation10], 4294966256 }
  0xbb   : > { %4211 = dma.done.wait (%p4990_p3), [#allocation13], 18432  }
  0xbc   : > { %4213 = vsyncadd (%p4990_p3), [#allocation13], 4294948864  ;;  %s501_s22 = sand.u32 1, %s4240_s21  }
  0xbd   : > { %s3111_s25 = sshll.u32 %s501_s22, 10  ;;  %s502_s0 = scalar_lea.sflag [#allocation16], %s501_s22 }
  0xbe   : > { %s4628_s2 = scalar_lea.vmem [#allocation15], %s3111_s25 }
  0xbf   : > { %4215 = dma.done.wait (%p4548_p12), %s502_s0, 16384  }
  0xc0   : > { %4217 = vsyncadd (%p4548_p12), %s502_s0, 4294950912  ;;  %s4991_s20 = sld [smem:[#allocation26_spill]]  ;;  %s550_s16 = sand.u32 1, %s4228_s18  }
  0xc1   : > { %s3112_s13 = sshll.u32 %s550_s16, 4  ;;  %s4992_s7 = sld [smem:[#allocation44_spill]] }
  0xc2   : > { %s4648_s9 = scalar_lea.vmem [#allocation17], %s3112_s13 }
  0xc6   : > { %s4636_s5 = sshll.u32 %s4991_s20, 1  ;;  %p3114_p12 = scmp.ne.s32.totalorder %s4991_s20, 0 }
  0xc7   : > { %p555_p4 = scmp.lt.s32.totalorder %s4636_s5, 3  ;;  %s4993_s15 = sld [smem:[#allocation40_spill]] (!%p3114_p12) }
  0xc8   : > { %564 = sbr.rel (%p3114_p12) target bundleno = 1102 (0x44e), region = 100  ;;  %s4994_s27 = sld [smem:[#allocation42_spill]] (!%p3114_p12) }
  0xc9   : > { %s4642_s4 = scalar_select %p555_p4, %s4636_s5, 3 }
  0xcb   : > { %s557_s29 = scalar_lea.vmem %s4992_s7, %s4642_s4 }
  0xcd   : > { %v3672_v0 = vld [vmem:[#allocation6 + $0x38] sm:$0xff]   ;;  %v4293_v1 = vmov 0.0   ;;  %v3673_v2 = vld [vmem:[#allocation6 + $0x30] sm:$0xff]   ;;  %vm4294_vm0 = vmmov 0   ;;  %v3674_v3 = vld [vmem:[#allocation6 + $0x28] sm:$0xff]   ;;  %v4295_v43 = vmov 0  }
  0xce   : > { %3430 = vmatprep.subr.bf16.mxu0 %v4293_v1  ;;  %3450 = vmatprep.subr.bf16.mxu1 %v4293_v1  ;;  %v3680_v4 = vld [vmem:[#allocation9 + $0x38] sm:$0xff]   ;;  %v3681_v6 = vld [vmem:[#allocation9 + $0x30] sm:$0xff]   ;;  %v3682_v8 = vld [vmem:[#allocation9 + $0x28] sm:$0xff]  }
  0xcf   : > { %3431 = vmatpush3.bf16.msra.mxu0 %v3672_v0  ;;  %3446 = vmatprep.mubr.msk.bf16.mxu0 %vm4294_vm0, %v4293_v1  ;;  %v3675_v5 = vld [vmem:[#allocation6 + $0x20] sm:$0xff]   ;;  %v3676_v7 = vld [vmem:[#allocation6 + $0x18] sm:$0xff]   ;;  %v3677_v9 = vld [vmem:[#allocation6 + $0x10] sm:$0xff]  }
  0xd0   : > { %3432 = vmatprep.subr.bf16.mxu0 %v4293_v1  ;;  %3466 = vmatprep.mubr.msk.bf16.mxu1 %vm4294_vm0, %v4293_v1  ;;  %v3683_v10 = vld [vmem:[#allocation9 + $0x20] sm:$0xff]   ;;  %v3684_v12 = vld [vmem:[#allocation9 + $0x18] sm:$0xff]   ;;  %v3685_v15 = vld [vmem:[#allocation9 + $0x10] sm:$0xff]  }
  0xd1   : > { %3451 = vmatpush3.bf16.msra.mxu1 %v3680_v4  ;;  %v3678_v11 = vld [vmem:[#allocation6 + $0x8] sm:$0xff]   ;;  %v3679_v13 = vld [vmem:[#allocation6] sm:$0xff]   ;;  %v565_v14 = vld [vmem:[%s472_s6] sm:$0xff] }
  0xd2   : > { %3452 = vmatprep.subr.bf16.mxu1 %v4293_v1  ;;  %v566_v16 = vpack.c.bf16 %v565_v14, %v565_v14  ;;  %v3686_v17 = vld [vmem:[#allocation9 + $0x8] sm:$0xff]   ;;  %v3687_v18 = vld [vmem:[#allocation9] sm:$0xff]   ;;  %v3688_v19 = vld [vmem:[#allocation12 + $0x70] ss:$8 sps:$4 sm:$0xff]  }
  0xd3   : > { %3433 = vmatpush3.bf16.msra.mxu0 %v3673_v2  ;;  %v3690_v20 = vld [vmem:[#allocation12 + $0x74] ss:$8 sps:$4 sm:$0xff]   ;;  %v3693_v21 = vld [vmem:[#allocation12 + $0x64] ss:$8 sps:$4 sm:$0xff]   ;;  %v3691_v22 = vld [vmem:[#allocation12 + $0x60] ss:$8 sps:$4 sm:$0xff]  }
  0xd4   : > { %3434 = vmatprep.subr.bf16.mxu0 %v4293_v1  ;;  %v3696_v23 = vld [vmem:[#allocation12 + $0x54] ss:$8 sps:$4 sm:$0xff]   ;;  %v3694_v24 = vld [vmem:[#allocation12 + $0x50] ss:$8 sps:$4 sm:$0xff]   ;;  %v3699_v25 = vld [vmem:[#allocation12 + $0x44] ss:$8 sps:$4 sm:$0xff]  }
  0xd5   : > { %3453 = vmatpush3.bf16.msra.mxu1 %v3681_v6  ;;  %v3697_v26 = vld [vmem:[#allocation12 + $0x40] ss:$8 sps:$4 sm:$0xff]   ;;  %v3702_v27 = vld [vmem:[#allocation12 + $0x34] ss:$8 sps:$4 sm:$0xff]   ;;  %v3700_v28 = vld [vmem:[#allocation12 + $0x30] ss:$8 sps:$4 sm:$0xff]  }
  0xd6   : > { %3454 = vmatprep.subr.bf16.mxu1 %v4293_v1  ;;  %v3705_v29 = vld [vmem:[#allocation12 + $0x24] ss:$8 sps:$4 sm:$0xff]   ;;  %v3703_v30 = vld [vmem:[#allocation12 + $0x20] ss:$8 sps:$4 sm:$0xff]   ;;  %v3708_v31 = vld [vmem:[#allocation12 + $0x14] ss:$8 sps:$4 sm:$0xff]  }
  0xd7   : > { %3435 = vmatpush3.bf16.msra.mxu0 %v3674_v3  ;;  %v3706_v32 = vld [vmem:[#allocation12 + $0x10] ss:$8 sps:$4 sm:$0xff]   ;;  %v3115_v33 = vld [vmem:[#allocation8] ss:$0 sm:$0xff]  ;;  %v3711_v41 = vld [vmem:[#allocation12 + $0x4] ss:$8 sps:$4 sm:$0xff]  }
  0xd8   : > { %3436 = vmatprep.subr.bf16.mxu0 %v4293_v1  ;;  %v3709_v42 = vld [vmem:[#allocation12] ss:$8 sps:$4 sm:$0xff]  }
  0xd9   : > { %3455 = vmatpush3.bf16.msra.mxu1 %v3682_v8  ;;  %v1002_v44 = vld [vmem:[#allocation14 + $0x1c0] sm:$0xff]  ;;  %v4653_v46 = vld [vmem:[#allocation14 + $0x1c8] sm:$0xff] }
  0xda   : > { %3456 = vmatprep.subr.bf16.mxu1 %v4293_v1  ;;  %v1006_v45 = vld [vmem:[#allocation14 + $0x1e0] sm:$0xff]  ;;  %v4655_v49 = vld [vmem:[#allocation14 + $0x1e8] sm:$0xff] }
  0xdb   : > { %3437 = vmatpush3.bf16.msra.mxu0 %v3675_v5  ;;  %v3205_v47 = vcombine.low %v1002_v44, %v1006_v45  ;;  %v3206_v48 = vcombine.high %v1002_v44, %v1006_v45  ;;  %v994_v50 = vld [vmem:[#allocation14 + $0x180] sm:$0xff]  ;;  %v3207_v52 = vcombine.low %v4653_v46, %v4655_v49  ;;  %v3208_v53 = vcombine.high %v4653_v46, %v4655_v49  ;;  %v995_v44 = vld [vmem:[#allocation14 + $0x188] sm:$0xff] }
  0xdc   : > { %3438 = vmatprep.subr.bf16.mxu0 %v4293_v1  ;;  %v998_v51 = vld [vmem:[#allocation14 + $0x1a0] sm:$0xff]  ;;  %v999_v45 = vld [vmem:[#allocation14 + $0x1a8] sm:$0xff] }
  0xdd   : > { %3457 = vmatpush3.bf16.msra.mxu1 %v3683_v10  ;;  %v3198_v54 = vcombine.high %v994_v50, %v998_v51  ;;  %v3197_v55 = vcombine.low %v994_v50, %v998_v51  ;;  %v986_v56 = vld [vmem:[#allocation14 + $0x140] sm:$0xff]  ;;  %v3200_v51 = vcombine.high %v995_v44, %v999_v45 }
  0xde   : > { %3458 = vmatprep.subr.bf16.mxu1 %v4293_v1  ;;  %v990_v57 = vld [vmem:[#allocation14 + $0x160] sm:$0xff] }
  0xdf   : > { %3439 = vmatpush3.bf16.msra.mxu0 %v3676_v7  ;;  %v3190_v58 = vcombine.high %v986_v56, %v990_v57  ;;  %v3189_v59 = vcombine.low %v986_v56, %v990_v57  ;;  %v978_v60 = vld [vmem:[#allocation14 + $0x100] sm:$0xff]  ;;  %v3199_v56 = vcombine.low %v995_v44, %v999_v45 }
  0xe0   : > { %3440 = vmatprep.subr.bf16.mxu0 %v4293_v1  ;;  %v982_v61 = vld [vmem:[#allocation14 + $0x120] sm:$0xff] }
  0xe1   : > { %3459 = vmatpush3.bf16.msra.mxu1 %v3684_v12  ;;  %v3182_v62 = vcombine.high %v978_v60, %v982_v61  ;;  %v3181_v63 = vcombine.low %v978_v60, %v982_v61  ;;  %v970_v0 = vld [vmem:[#allocation14 + $0xc0] sm:$0xff] }
  0xe2   : > { %3460 = vmatprep.subr.bf16.mxu1 %v4293_v1  ;;  %v962_v4 = vld [vmem:[#allocation14 + $0x80] sm:$0xff] }
  0xe3   : > { %3441 = vmatpush3.bf16.msra.mxu0 %v3677_v9  ;;  %v966_v5 = vld [vmem:[#allocation14 + $0xa0] sm:$0xff] }
  0xe4   : > { %3442 = vmatprep.subr.bf16.mxu0 %v4293_v1  ;;  %v3166_v6 = vcombine.high %v962_v4, %v966_v5  ;;  %v3165_v7 = vcombine.low %v962_v4, %v966_v5  ;;  %v954_v8 = vld [vmem:[#allocation14 + $0x40] sm:$0xff]  ;;  %v959_v4 = vld [vmem:[#allocation14 + $0x68] sm:$0xff] }
  0xe5   : > { %3461 = vmatpush3.bf16.msra.mxu1 %v3685_v15  ;;  %v958_v9 = vld [vmem:[#allocation14 + $0x60] sm:$0xff] }
  0xe6   : > { %3462 = vmatprep.subr.bf16.mxu1 %v4293_v1  ;;  %v3158_v10 = vcombine.high %v954_v8, %v958_v9  ;;  %v946_v12 = vld [vmem:[#allocation14] sm:$0xff] }
  0xe7   : > { %3443 = vmatpush3.bf16.msra.mxu0 %v3678_v11  ;;  %v3157_v11 = vcombine.low %v954_v8, %v958_v9  ;;  %v951_v8 = vld [vmem:[#allocation14 + $0x28] sm:$0xff]  ;;  %v1010_v44 = vld [vmem:[#allocation14 + $0x200] sm:$0xff] }
  0xe8   : > { %3444 = vmatprep.subr.bf16.mxu0 %v4293_v1  ;;  %v1014_v45 = vld [vmem:[#allocation14 + $0x220] sm:$0xff] }
  0xe9   : > { %3463 = vmatpush3.bf16.msra.mxu1 %v3686_v17  ;;  %v1070_v17 = vld [vmem:[#allocation14 + $0x3e0] sm:$0xff] }
  0xea   : > { %3464 = vmatprep.subr.bf16.mxu1 %v4293_v1  ;;  %v974_v1 = vld [vmem:[#allocation14 + $0xe0] sm:$0xff] }
  0xeb   : > { %3445 = vmatpush3.bf16.msra.mxu0 %v3679_v13  ;;  %v3174_v2 = vcombine.high %v970_v0, %v974_v1  ;;  %v3173_v3 = vcombine.low %v970_v0, %v974_v1  ;;  %v950_v13 = vld [vmem:[#allocation14 + $0x20] sm:$0xff] }
  0xec   : > { %901 = vmatprep.subr.bf16.mxu0 %v3690_v20  ;;  %v3150_v14 = vcombine.high %v946_v12, %v950_v13  ;;  %v3149_v15 = vcombine.low %v946_v12, %v950_v13  ;;  %v1058_v20 = vld [vmem:[#allocation14 + $0x380] sm:$0xff]  ;;  %v1071_v12 = vld [vmem:[#allocation14 + $0x3e8] sm:$0xff] }
  0xed   : > { %3465 = vmatpush3.bf16.msra.mxu1 %v3687_v18 }
  0xee   : > { %3447 = vmatmul.mubr.bf16.vlgmr.msra.gmra.mxu0 %v566_v16  ;;  %1756 = vmatprep.subr.bf16.mxu1 %v3206_v48  ;;  %v1066_v16 = vld [vmem:[#allocation14 + $0x3c0] sm:$0xff] }
  0xef   : > { %902 = vmatpush1.bf16.msra.mxu0 %v3688_v19  ;;  %933 = vmatprep.mubr.bf16.mxu0 %v4295_v43  ;;  %v3270_v18 = vcombine.high %v1066_v16, %v1070_v17  ;;  %v3269_v19 = vcombine.low %v1066_v16, %v1070_v17  ;;  %v1063_v16 = vld [vmem:[#allocation14 + $0x3a8] sm:$0xff] }
  0xf0   : > { %903 = vmatprep.subr.bf16.mxu0 %v3693_v21  ;;  %v1062_v21 = vld [vmem:[#allocation14 + $0x3a0] sm:$0xff] }
  0xf3   : > { %904 = vmatpush1.bf16.msra.mxu0 %v3691_v22  ;;  %v3262_v22 = vcombine.high %v1058_v20, %v1062_v21 }
  0xf4   : > { %905 = vmatprep.subr.bf16.mxu0 %v3696_v23  ;;  %v3261_v23 = vcombine.low %v1058_v20, %v1062_v21  ;;  %v1055_v20 = vld [vmem:[#allocation14 + $0x368] sm:$0xff] }
  0xf7   : > { %906 = vmatpush1.bf16.msra.mxu0 %v3694_v24  ;;  %v1050_v24 = vld [vmem:[#allocation14 + $0x340] sm:$0xff] }
  0xf8   : > { %907 = vmatprep.subr.bf16.mxu0 %v3699_v25  ;;  %v1054_v25 = vld [vmem:[#allocation14 + $0x360] sm:$0xff] }
  0xfb   : > { %908 = vmatpush1.bf16.msra.mxu0 %v3697_v26  ;;  %v3254_v26 = vcombine.high %v1050_v24, %v1054_v25 }
  0xfc   : > { %909 = vmatprep.subr.bf16.mxu0 %v3702_v27  ;;  %v3253_v27 = vcombine.low %v1050_v24, %v1054_v25  ;;  %v1047_v24 = vld [vmem:[#allocation14 + $0x328] sm:$0xff] }
  0xff   : > { %910 = vmatpush1.bf16.msra.mxu0 %v3700_v28  ;;  %v1042_v28 = vld [vmem:[#allocation14 + $0x300] sm:$0xff] }
 0x100   : > { %911 = vmatprep.subr.bf16.mxu0 %v3705_v29  ;;  %v1046_v29 = vld [vmem:[#allocation14 + $0x320] sm:$0xff] }
 0x103   : > { %912 = vmatpush1.bf16.msra.mxu0 %v3703_v30  ;;  %v3246_v30 = vcombine.high %v1042_v28, %v1046_v29 }
 0x104   : > { %913 = vmatprep.subr.bf16.mxu0 %v3708_v31  ;;  %v3245_v31 = vcombine.low %v1042_v28, %v1046_v29  ;;  %v1039_v28 = vld [vmem:[#allocation14 + $0x2e8] sm:$0xff] }
 0x107   : > { %914 = vmatpush1.bf16.msra.mxu0 %v3706_v32  ;;  %v1034_v32 = vld [vmem:[#allocation14 + $0x2c0] sm:$0xff] }
 0x108   : > { %915 = vmatprep.subr.bf16.mxu0 %v3711_v41 }
 0x10b   : > { %916 = vmatpush1.bf16.msra.mxu0 %v3709_v42 }
 0x10c   : > { %1797 = vmatprep.subr.bf16.mxu0 %v3208_v53 }
 0x1ae   : > { %v672_v34 = vpop.f32.mrf.mxu0 }
 0x1af   : > { %v673_v35 = vadd.f32 %v3115_v33, %v672_v34  ;;  %v1038_v33 = vld [vmem:[#allocation14 + $0x2e0] sm:$0xff] }
 0x1b0   : > { %v3448_v36 = vpop.f32.mrf.mxu0  ;;  %v3238_v34 = vcombine.high %v1034_v32, %v1038_v33 }
 0x1b1   : > { %v678_v37 = vmax.f32 %v673_v35, 0.0  ;;  %v3237_v35 = vcombine.low %v1034_v32, %v1038_v33  ;;  %v1026_v36 = vld [vmem:[#allocation14 + $0x280] sm:$0xff]  ;;  %v1031_v32 = vld [vmem:[#allocation14 + $0x2a8] sm:$0xff] }
 0x1b2   : > { %v675_v38 = vpop.f32.mrf.mxu0 }
 0x1b3   : > { %v679_v39 = vpack.c.bf16 %v678_v37, %v678_v37  ;;  %v1030_v37 = vld [vmem:[#allocation14 + $0x2a0] sm:$0xff] }
 0x1b4   : > { %v3449_v40 = vpop.f32.mrf.mxu0  ;;  %v3230_v38 = vcombine.high %v1026_v36, %v1030_v37 }
 0x1b5   : > { %3467 = vmatmul.mubr.bf16.vlgmr.msra.gmra.mxu1 %v679_v39  ;;  %v3229_v39 = vcombine.low %v1026_v36, %v1030_v37  ;;  %v3124_v40 = vld [vmem:[#allocation11] ss:$0 sm:$0xff]  ;;  %v1018_v36 = vld [vmem:[#allocation14 + $0x240] sm:$0xff] }
 0x1b6   : > { %1757 = vmatpush1.bf16.msra.mxu1 %v3205_v47  ;;  %v1022_v37 = vld [vmem:[#allocation14 + $0x260] sm:$0xff] }
 0x1b7   : > { %1758 = vmatprep.subr.bf16.mxu1 %v3198_v54  ;;  %v987_v54 = vld [vmem:[#allocation14 + $0x148] sm:$0xff] }
 0x1ba   : > { %1759 = vmatpush1.bf16.msra.mxu1 %v3197_v55  ;;  %v991_v55 = vld [vmem:[#allocation14 + $0x168] sm:$0xff] }
 0x1bb   : > { %1760 = vmatprep.subr.bf16.mxu1 %v3190_v58  ;;  %v3192_v57 = vcombine.high %v987_v54, %v991_v55  ;;  %v979_v58 = vld [vmem:[#allocation14 + $0x108] sm:$0xff]  ;;  %v3191_v60 = vcombine.low %v987_v54, %v991_v55  ;;  %v1004_v55 = vld [vmem:[#allocation14 + $0x1d0] sm:$0xff] }
 0x1be   : > { %1761 = vmatpush1.bf16.msra.mxu1 %v3189_v59  ;;  %v983_v59 = vld [vmem:[#allocation14 + $0x128] sm:$0xff] }
 0x1bf   : > { %1762 = vmatprep.subr.bf16.mxu1 %v3182_v62  ;;  %v3184_v61 = vcombine.high %v979_v58, %v983_v59  ;;  %v971_v62 = vld [vmem:[#allocation14 + $0xc8] sm:$0xff]  ;;  %v3183_v0 = vcombine.low %v979_v58, %v983_v59  ;;  %v1009_v59 = vld [vmem:[#allocation14 + $0x1f8] sm:$0xff] }
 0x1c2   : > { %1763 = vmatpush1.bf16.msra.mxu1 %v3181_v63  ;;  %v975_v63 = vld [vmem:[#allocation14 + $0xe8] sm:$0xff] }
 0x1c3   : > { %1764 = vmatprep.subr.bf16.mxu1 %v3174_v2  ;;  %v3176_v1 = vcombine.high %v971_v62, %v975_v63  ;;  %v963_v2 = vld [vmem:[#allocation14 + $0x88] sm:$0xff]  ;;  %v3175_v46 = vcombine.low %v971_v62, %v975_v63  ;;  %v811_v63 = vlaneseq }
 0x1c6   : > { %1765 = vmatpush1.bf16.msra.mxu1 %v3173_v3  ;;  %v967_v3 = vld [vmem:[#allocation14 + $0xa8] sm:$0xff] }
 0x1c7   : > { %1766 = vmatprep.subr.bf16.mxu1 %v3166_v6  ;;  %v3168_v49 = vcombine.high %v963_v2, %v967_v3  ;;  %v3167_v5 = vcombine.low %v963_v2, %v967_v3  ;;  %v809_v2 = vld [vmem:[%s4993_s15] sm:$0x3] }
 0x1ca   : > { %1767 = vmatpush1.bf16.msra.mxu1 %v3165_v7  ;;  %v947_v7 = vld [vmem:[#allocation14 + $0x8] sm:$0xff] }
 0x1cb   : > { %1768 = vmatprep.subr.bf16.mxu1 %v3158_v10  ;;  %v3152_v10 = vcombine.high %v947_v7, %v951_v8  ;;  %v3151_v13 = vcombine.low %v947_v7, %v951_v8 }
 0x1ce   : > { %1769 = vmatpush1.bf16.msra.mxu1 %v3157_v11  ;;  %v1067_v11 = vld [vmem:[#allocation14 + $0x3c8] sm:$0xff] }
 0x1cf   : > { %1770 = vmatprep.subr.bf16.mxu1 %v3150_v14  ;;  %v3272_v14 = vcombine.high %v1067_v11, %v1071_v12  ;;  %v3271_v17 = vcombine.low %v1067_v11, %v1071_v12  ;;  %v1000_v12 = vld [vmem:[#allocation14 + $0x1b0] sm:$0xff] }
 0x1d2   : > { %1771 = vmatpush1.bf16.msra.mxu1 %v3149_v15  ;;  %v1059_v15 = vld [vmem:[#allocation14 + $0x388] sm:$0xff] }
 0x1d3   : > { %1772 = vmatprep.subr.bf16.mxu1 %v3270_v18  ;;  %v3264_v18 = vcombine.high %v1059_v15, %v1063_v16  ;;  %v3263_v21 = vcombine.low %v1059_v15, %v1063_v16 }
 0x1d6   : > { %1773 = vmatpush2.bf16.msra.mxu1 %v3269_v19  ;;  %v1051_v19 = vld [vmem:[#allocation14 + $0x348] sm:$0xff] }
 0x1d7   : > { %1774 = vmatprep.subr.bf16.mxu1 %v3262_v22  ;;  %v3256_v22 = vcombine.high %v1051_v19, %v1055_v20  ;;  %v3255_v25 = vcombine.low %v1051_v19, %v1055_v20  ;;  %v992_v20 = vld [vmem:[#allocation14 + $0x170] sm:$0xff] }
 0x1da   : > { %1775 = vmatpush2.bf16.msra.mxu1 %v3261_v23  ;;  %v1043_v23 = vld [vmem:[#allocation14 + $0x308] sm:$0xff] }
 0x1db   : > { %1776 = vmatprep.subr.bf16.mxu1 %v3254_v26  ;;  %v3248_v26 = vcombine.high %v1043_v23, %v1047_v24  ;;  %v3247_v29 = vcombine.low %v1043_v23, %v1047_v24 }
 0x1de   : > { %1777 = vmatpush2.bf16.msra.mxu1 %v3253_v27  ;;  %v1035_v27 = vld [vmem:[#allocation14 + $0x2c8] sm:$0xff] }
 0x1df   : > { %1778 = vmatprep.subr.bf16.mxu1 %v3246_v30  ;;  %v3240_v30 = vcombine.high %v1035_v27, %v1039_v28  ;;  %v3239_v33 = vcombine.low %v1035_v27, %v1039_v28  ;;  %v980_v27 = vld [vmem:[#allocation14 + $0x110] sm:$0xff] }
 0x1e0   : > { %v984_v28 = vld [vmem:[#allocation14 + $0x130] sm:$0xff] }
 0x1e2   : > { %1779 = vmatpush2.bf16.msra.mxu1 %v3245_v31  ;;  %v1027_v31 = vld [vmem:[#allocation14 + $0x288] sm:$0xff] }
 0x1e3   : > { %1780 = vmatprep.subr.bf16.mxu1 %v3238_v34  ;;  %v3232_v34 = vcombine.high %v1027_v31, %v1031_v32 }
 0x1e6   : > { %1781 = vmatpush2.bf16.msra.mxu1 %v3237_v35  ;;  %v3231_v35 = vcombine.low %v1027_v31, %v1031_v32 }
 0x1e7   : > { %1782 = vmatprep.subr.bf16.mxu1 %v3230_v38  ;;  %v1019_v38 = vld [vmem:[#allocation14 + $0x248] sm:$0xff] }
 0x1ea   : > { %1783 = vmatpush2.bf16.msra.mxu1 %v3229_v39  ;;  %v3222_v39 = vcombine.high %v1018_v36, %v1022_v37 }
 0x1ec   : > { %1784 = vmatprep.subr.bf16.mxu1 %v3222_v39  ;;  %v3185_v39 = vcombine.low %v980_v27, %v984_v28 }
 0x275   : > { %v785_v41 = vpop.f32.mrf.mxu1 }
 0x276   : > { %v786_v42 = vadd.f32 %v3124_v40, %v785_v41  ;;  %v1023_v40 = vld [vmem:[#allocation14 + $0x268] sm:$0xff]  ;;  %v3221_v41 = vcombine.low %v1018_v36, %v1022_v37  ;;  %v976_v36 = vld [vmem:[#allocation14 + $0xf0] sm:$0xff]  ;;  %v973_v37 = vld [vmem:[#allocation14 + $0xd8] sm:$0xff] }
 0x277   : > { %v3468_v43 = vpop.f32.mrf.mxu1 }
 0x278   : > { %v791_v47 = vmax.f32 %v786_v42, 0.0  ;;  %v3223_v42 = vcombine.low %v1019_v38, %v1023_v40  ;;  %v3224_v43 = vcombine.high %v1019_v38, %v1023_v40  ;;  %1785 = vmatpush2.bf16.msra.mxu1 %v3221_v41  ;;  %v977_v38 = vld [vmem:[#allocation14 + $0xf8] sm:$0xff] }
 0x279   : > { %v788_v48 = vpop.f32.mrf.mxu1 }
 0x27a   : > { %v792_v50 = vpack.c.bf16 %v791_v47, %v791_v47  ;;  %v1011_v47 = vld [vmem:[#allocation14 + $0x208] sm:$0xff]  ;;  %v3214_v48 = vcombine.high %v1010_v44, %v1014_v45 }
 0x27b   : > { %v3469_v53 = vpop.f32.mrf.mxu1 }
 0x27c   : > { %934 = vmatmul.mubr.bf16.vlgmr.msra.gmra.mxu0 %v792_v50  ;;  %v1015_v50 = vld [vmem:[#allocation14 + $0x228] sm:$0xff]  ;;  %1786 = vmatprep.subr.bf16.mxu1 %v3214_v48 }
 0x27d   : > { %1798 = vmatpush1.bf16.msra.mxu0 %v3207_v52  ;;  %v955_v52 = vld [vmem:[#allocation14 + $0x48] sm:$0xff]  ;;  %v3215_v53 = vcombine.low %v1011_v47, %v1015_v50  ;;  %v3216_v54 = vcombine.high %v1011_v47, %v1015_v50  ;;  %v969_v47 = vld [vmem:[#allocation14 + $0xb8] sm:$0xff]  ;;  %v3179_v50 = vcombine.low %v973_v37, %v977_v38 }
 0x27e   : > { %1799 = vmatprep.subr.bf16.mxu0 %v3200_v51  ;;  %v3160_v6 = vcombine.high %v955_v52, %v959_v4  ;;  %v3159_v9 = vcombine.low %v955_v52, %v959_v4  ;;  %v3213_v51 = vcombine.low %v1010_v44, %v1014_v45  ;;  %v968_v44 = vld [vmem:[#allocation14 + $0xb0] sm:$0xff]  ;;  %v965_v45 = vld [vmem:[#allocation14 + $0x98] sm:$0xff] }
 0x280   : > { %1787 = vmatpush2.bf16.msra.mxu1 %v3213_v51 }
 0x281   : > { %1800 = vmatpush1.bf16.msra.mxu0 %v3199_v56  ;;  %v1008_v56 = vld [vmem:[#allocation14 + $0x1f0] sm:$0xff] }
 0x282   : > { %1801 = vmatprep.subr.bf16.mxu0 %v3192_v57  ;;  %v1005_v57 = vld [vmem:[#allocation14 + $0x1d8] sm:$0xff]  ;;  %v3210_v58 = vcombine.high %v1004_v55, %v1008_v56 }
 0x283   : > { %v3212_v62 = vcombine.high %v1005_v57, %v1009_v59 }
 0x284   : > { %1838 = vmatprep.subr.bf16.mxu1 %v3210_v58 }
 0x285   : > { %1802 = vmatpush1.bf16.msra.mxu0 %v3191_v60  ;;  %v3209_v60 = vcombine.low %v1004_v55, %v1008_v56  ;;  %v960_v55 = vld [vmem:[#allocation14 + $0x70] sm:$0xff]  ;;  %v957_v56 = vld [vmem:[#allocation14 + $0x58] sm:$0xff] }
 0x286   : > { %1803 = vmatprep.subr.bf16.mxu0 %v3184_v61  ;;  %v3211_v61 = vcombine.low %v1005_v57, %v1009_v59  ;;  %v961_v57 = vld [vmem:[#allocation14 + $0x78] sm:$0xff]  ;;  %v3171_v59 = vcombine.low %v965_v45, %v969_v47 }
 0x289   : > { %1804 = vmatpush1.bf16.msra.mxu0 %v3183_v0  ;;  %v4664_v0 = vshrl.u32 %v811_v63, 7  ;;  %v952_v63 = vld [vmem:[#allocation14 + $0x30] sm:$0xff] }
 0x28a   : > { %1805 = vmatprep.subr.bf16.mxu0 %v3176_v1 }
 0x28b   : > { %v813_v1 = vsub.s32 0, %v4664_v0  ;;  %v817_v3 = vsub.s32 1, %v4664_v0 }
 0x28d   : > { %1806 = vmatpush1.bf16.msra.mxu0 %v3175_v46  ;;  %v814_v46 = vrot.slane %v809_v2, %v813_v1 }
 0x28e   : > { %1807 = vmatprep.subr.bf16.mxu0 %v3168_v49  ;;  %v818_v49 = vrot.slane %v809_v2, %v817_v3  ;;  %v949_v2 = vld [vmem:[#allocation14 + $0x18] sm:$0xff] }
 0x291   : > { %1808 = vmatpush1.bf16.msra.mxu0 %v3167_v5 }
 0x292   : > { %1809 = vmatprep.subr.bf16.mxu0 %v3160_v6 }
 0x295   : > { %1810 = vmatpush1.bf16.msra.mxu0 %v3159_v9 }
 0x296   : > { %1811 = vmatprep.subr.bf16.mxu0 %v3152_v10  ;;  %v996_v10 = vld [vmem:[#allocation14 + $0x190] sm:$0xff] }
 0x297   : > { %v3201_v23 = vcombine.low %v996_v10, %v1000_v12 }
 0x299   : > { %1812 = vmatpush1.bf16.msra.mxu0 %v3151_v13  ;;  %v997_v13 = vld [vmem:[#allocation14 + $0x198] sm:$0xff] }
 0x29a   : > { %1813 = vmatprep.subr.bf16.mxu0 %v3272_v14  ;;  %v1001_v14 = vld [vmem:[#allocation14 + $0x1b8] sm:$0xff] }
 0x29b   : > { %v3204_v19 = vcombine.high %v997_v13, %v1001_v14  ;;  %v3203_v24 = vcombine.low %v997_v13, %v1001_v14  ;;  %v1060_v14 = vld [vmem:[#allocation14 + $0x390] sm:$0xff] }
 0x29d   : > { %1814 = vmatpush2.bf16.msra.mxu0 %v3271_v17  ;;  %v988_v17 = vld [vmem:[#allocation14 + $0x150] sm:$0xff] }
 0x29e   : > { %1815 = vmatprep.subr.bf16.mxu0 %v3264_v18  ;;  %v3202_v18 = vcombine.high %v996_v10, %v1000_v12  ;;  %v3193_v31 = vcombine.low %v988_v17, %v992_v20 }
 0x2a1   : > { %1816 = vmatpush2.bf16.msra.mxu0 %v3263_v21  ;;  %v989_v21 = vld [vmem:[#allocation14 + $0x158] sm:$0xff] }
 0x2a2   : > { %1817 = vmatprep.subr.bf16.mxu0 %v3256_v22  ;;  %v993_v22 = vld [vmem:[#allocation14 + $0x178] sm:$0xff] }
 0x2a3   : > { %v3195_v32 = vcombine.low %v989_v21, %v993_v22 }
 0x2a5   : > { %1818 = vmatpush2.bf16.msra.mxu0 %v3255_v25  ;;  %v3194_v25 = vcombine.high %v988_v17, %v992_v20  ;;  %v1061_v17 = vld [vmem:[#allocation14 + $0x398] sm:$0xff] }
 0x2a6   : > { %1819 = vmatprep.subr.bf16.mxu0 %v3248_v26  ;;  %v3196_v26 = vcombine.high %v989_v21, %v993_v22 }
 0x2a9   : > { %1820 = vmatpush2.bf16.msra.mxu0 %v3247_v29  ;;  %v981_v29 = vld [vmem:[#allocation14 + $0x118] sm:$0xff] }
 0x2aa   : > { %1821 = vmatprep.subr.bf16.mxu0 %v3240_v30  ;;  %v985_v30 = vld [vmem:[#allocation14 + $0x138] sm:$0xff] }
 0x2ab   : > { %v3187_v40 = vcombine.low %v981_v29, %v985_v30 }
 0x2ad   : > { %1822 = vmatpush2.bf16.msra.mxu0 %v3239_v33  ;;  %v3186_v33 = vcombine.high %v980_v27, %v984_v28 }
 0x2ae   : > { %1823 = vmatprep.subr.bf16.mxu0 %v3232_v34  ;;  %v3188_v34 = vcombine.high %v981_v29, %v985_v30 }
 0x2b1   : > { %1824 = vmatpush2.bf16.msra.mxu0 %v3231_v35  ;;  %v972_v35 = vld [vmem:[#allocation14 + $0xd0] sm:$0xff] }
 0x2b2   : > { %1825 = vmatprep.subr.bf16.mxu0 %v3224_v43  ;;  %v3178_v41 = vcombine.high %v972_v35, %v976_v36  ;;  %v964_v43 = vld [vmem:[#allocation14 + $0x90] sm:$0xff]  ;;  %v3177_v48 = vcombine.low %v972_v35, %v976_v36 }
 0x2b3   : > { %v3170_v51 = vcombine.high %v964_v43, %v968_v44  ;;  %v3169_v58 = vcombine.low %v964_v43, %v968_v44 }
 0x2b5   : > { %1826 = vmatpush2.bf16.msra.mxu0 %v3223_v42  ;;  %v3180_v42 = vcombine.high %v973_v37, %v977_v38 }
 0x2b6   : > { %1827 = vmatprep.subr.bf16.mxu0 %v3216_v54  ;;  %v956_v54 = vld [vmem:[#allocation14 + $0x50] sm:$0xff] }
 0x2b9   : > { %1828 = vmatpush2.bf16.msra.mxu0 %v3215_v53  ;;  %v3172_v53 = vcombine.high %v965_v45, %v969_v47 }
 0x2ba   : > { %1879 = vmatprep.subr.bf16.mxu0 %v3212_v62  ;;  %v948_v62 = vld [vmem:[#allocation14 + $0x10] sm:$0xff] }
 0x2bb   : > { %v3153_v10 = vcombine.low %v948_v62, %v952_v63 }
 0x33c   : > { %v935_v52 = vpop.f32.mrf.mxu0 }
 0x33d   : > { %v936_v4 = vadd.f32 %v935_v52, %v814_v46  ;;  %v953_v46 = vld [vmem:[#allocation14 + $0x38] sm:$0xff]  ;;  %v3163_v52 = vcombine.low %v957_v56, %v961_v57 }
 0x33e   : > { %v937_v5 = vpop.f32.mrf.mxu0 }
 0x33f   : > { %v938_v6 = vadd.f32 %v937_v5, %v818_v49  ;;  %v942_v7 = vmax.f32 %v936_v4, 0.0  ;;  %v3161_v49 = vcombine.low %v956_v54, %v960_v55  ;;  %v3154_v4 = vcombine.high %v948_v62, %v952_v63 }
 0x340   : > { %v939_v8 = vpop.f32.mrf.mxu0  ;;  %v3156_v5 = vcombine.high %v949_v2, %v953_v46 }
 0x341   : > { %v943_v9 = vmax.f32 %v938_v6, 0.0  ;;  %v4675_v16 = vpack.c.bf16 %v942_v7, %v942_v7  ;;  %v1068_v6 = vld [vmem:[#allocation14 + $0x3d0] sm:$0xff]  ;;  %v1069_v8 = vld [vmem:[#allocation14 + $0x3d8] sm:$0xff] }
 0x342   : > { %v940_v11 = vpop.f32.mrf.mxu0  ;;  %v1072_v7 = vld [vmem:[#allocation14 + $0x3f0] sm:$0xff] }
 0x343   : > { %v945_v15 = vpack.c.bf16 %v943_v9, %v943_v9  ;;  %v1073_v9 = vld [vmem:[#allocation14 + $0x3f8] sm:$0xff]  ;;  %v3155_v11 = vcombine.low %v949_v2, %v953_v46  ;;  %v3274_v12 = vcombine.high %v1068_v6, %v1072_v7 }
 0x344   : > { %v3276_v13 = vcombine.high %v1069_v8, %v1073_v9  ;;  %v3275_v20 = vcombine.low %v1069_v8, %v1073_v9 }
 0x345   : > { %1788 = vmatprep.mubr.bf16.mxu1 %v945_v15  ;;  %1829 = vmatprep.mubr.bf16.mxu0 %v945_v15 }
 0x346   : > { %1789 = vmatmul.mubr.bf16.vlgmr.msra.gmra.mxu1 %v4675_v16  ;;  %1830 = vmatmul.mubr.bf16.vlgmr.msra.gmra.mxu0 %v4675_v16 }
 0x347   : > { %1839 = vmatpush1.bf16.msra.mxu1 %v3209_v60  ;;  %1880 = vmatpush1.bf16.msra.mxu0 %v3211_v61  ;;  %v3162_v60 = vcombine.high %v956_v54, %v960_v55  ;;  %v3164_v61 = vcombine.high %v957_v56, %v961_v57 }
 0x348   : > { %1870 = vmatprep.mubr.bf16.mxu1 %v945_v15  ;;  %1911 = vmatprep.mubr.bf16.mxu0 %v945_v15  ;;  %v1064_v15 = vld [vmem:[#allocation14 + $0x3b0] sm:$0xff] }
 0x349   : > { %1840 = vmatprep.subr.bf16.mxu1 %v3202_v18  ;;  %1881 = vmatprep.subr.bf16.mxu0 %v3204_v19  ;;  %v1065_v18 = vld [vmem:[#allocation14 + $0x3b8] sm:$0xff]  ;;  %v3273_v19 = vcombine.low %v1068_v6, %v1072_v7  ;;  %v3266_v21 = vcombine.high %v1060_v14, %v1064_v15  ;;  %v3265_v27 = vcombine.low %v1060_v14, %v1064_v15  ;;  %v1090_v14 = vsub.s32 3, %v4664_v0 }
 0x34a   : > { %v3268_v22 = vcombine.high %v1061_v17, %v1065_v18  ;;  %v3267_v28 = vcombine.low %v1061_v17, %v1065_v18 }
 0x34b   : > { %1841 = vmatpush1.bf16.msra.mxu1 %v3201_v23  ;;  %1882 = vmatpush1.bf16.msra.mxu0 %v3203_v24  ;;  %v1052_v23 = vld [vmem:[#allocation14 + $0x350] sm:$0xff] }
 0x34c   : > { %1842 = vmatprep.subr.bf16.mxu1 %v3194_v25  ;;  %1883 = vmatprep.subr.bf16.mxu0 %v3196_v26  ;;  %v1056_v24 = vld [vmem:[#allocation14 + $0x370] sm:$0xff]  ;;  %v1053_v25 = vld [vmem:[#allocation14 + $0x358] sm:$0xff] }
 0x34d   : > { %v1057_v26 = vld [vmem:[#allocation14 + $0x378] sm:$0xff]  ;;  %v3258_v29 = vcombine.high %v1052_v23, %v1056_v24  ;;  %v3257_v35 = vcombine.low %v1052_v23, %v1056_v24 }
 0x34e   : > { %v3260_v30 = vcombine.high %v1053_v25, %v1057_v26  ;;  %v3259_v36 = vcombine.low %v1053_v25, %v1057_v26 }
 0x34f   : > { %1843 = vmatpush1.bf16.msra.mxu1 %v3193_v31  ;;  %1884 = vmatpush1.bf16.msra.mxu0 %v3195_v32  ;;  %v1044_v31 = vld [vmem:[#allocation14 + $0x310] sm:$0xff] }
 0x350   : > { %1844 = vmatprep.subr.bf16.mxu1 %v3186_v33  ;;  %1885 = vmatprep.subr.bf16.mxu0 %v3188_v34  ;;  %v1048_v32 = vld [vmem:[#allocation14 + $0x330] sm:$0xff]  ;;  %v1045_v33 = vld [vmem:[#allocation14 + $0x318] sm:$0xff] }
 0x351   : > { %v1049_v34 = vld [vmem:[#allocation14 + $0x338] sm:$0xff]  ;;  %v3250_v37 = vcombine.high %v1044_v31, %v1048_v32  ;;  %v3249_v43 = vcombine.low %v1044_v31, %v1048_v32 }
 0x352   : > { %v3252_v38 = vcombine.high %v1045_v33, %v1049_v34  ;;  %v3251_v44 = vcombine.low %v1045_v33, %v1049_v34  ;;  %v1102_v34 = vsub.s32 6, %v4664_v0 }
 0x353   : > { %1845 = vmatpush1.bf16.msra.mxu1 %v3185_v39  ;;  %1886 = vmatpush1.bf16.msra.mxu0 %v3187_v40  ;;  %v1036_v39 = vld [vmem:[#allocation14 + $0x2d0] sm:$0xff] }
 0x354   : > { %1846 = vmatprep.subr.bf16.mxu1 %v3178_v41  ;;  %1887 = vmatprep.subr.bf16.mxu0 %v3180_v42  ;;  %v1040_v40 = vld [vmem:[#allocation14 + $0x2f0] sm:$0xff]  ;;  %v1037_v41 = vld [vmem:[#allocation14 + $0x2d8] sm:$0xff] }
 0x355   : > { %v1041_v42 = vld [vmem:[#allocation14 + $0x2f8] sm:$0xff]  ;;  %v3242_v45 = vcombine.high %v1036_v39, %v1040_v40  ;;  %v3241_v54 = vcombine.low %v1036_v39, %v1040_v40 }
 0x356   : > { %v3244_v47 = vcombine.high %v1037_v41, %v1041_v42  ;;  %v3243_v55 = vcombine.low %v1037_v41, %v1041_v42 }
 0x357   : > { %1847 = vmatpush1.bf16.msra.mxu1 %v3177_v48  ;;  %1888 = vmatpush1.bf16.msra.mxu0 %v3179_v50  ;;  %v1028_v48 = vld [vmem:[#allocation14 + $0x290] sm:$0xff] }
 0x358   : > { %1848 = vmatprep.subr.bf16.mxu1 %v3170_v51  ;;  %1889 = vmatprep.subr.bf16.mxu0 %v3172_v53  ;;  %v1032_v50 = vld [vmem:[#allocation14 + $0x2b0] sm:$0xff]  ;;  %v1029_v51 = vld [vmem:[#allocation14 + $0x298] sm:$0xff] }
 0x359   : > { %v1033_v53 = vld [vmem:[#allocation14 + $0x2b8] sm:$0xff]  ;;  %v3234_v56 = vcombine.high %v1028_v48, %v1032_v50  ;;  %v3233_v62 = vcombine.low %v1028_v48, %v1032_v50 }
 0x35a   : > { %v3236_v57 = vcombine.high %v1029_v51, %v1033_v53  ;;  %v3235_v63 = vcombine.low %v1029_v51, %v1033_v53 }
 0x35b   : > { %1849 = vmatpush1.bf16.msra.mxu1 %v3169_v58  ;;  %1890 = vmatpush1.bf16.msra.mxu0 %v3171_v59  ;;  %v1020_v58 = vld [vmem:[#allocation14 + $0x250] sm:$0xff] }
 0x35c   : > { %1850 = vmatprep.subr.bf16.mxu1 %v3162_v60  ;;  %1891 = vmatprep.subr.bf16.mxu0 %v3164_v61  ;;  %v1024_v59 = vld [vmem:[#allocation14 + $0x270] sm:$0xff]  ;;  %v1021_v60 = vld [vmem:[#allocation14 + $0x258] sm:$0xff] }
 0x35d   : > { %v1025_v61 = vld [vmem:[#allocation14 + $0x278] sm:$0xff]  ;;  %v3226_v2 = vcombine.high %v1020_v58, %v1024_v59  ;;  %v3225_v6 = vcombine.low %v1020_v58, %v1024_v59 }
 0x35e   : > { %v3228_v46 = vcombine.high %v1021_v60, %v1025_v61  ;;  %v3227_v7 = vcombine.low %v1021_v60, %v1025_v61 }
 0x35f   : > { %1851 = vmatpush1.bf16.msra.mxu1 %v3161_v49  ;;  %1892 = vmatpush1.bf16.msra.mxu0 %v3163_v52  ;;  %v1012_v49 = vld [vmem:[#allocation14 + $0x210] sm:$0xff] }
 0x360   : > { %1852 = vmatprep.subr.bf16.mxu1 %v3154_v4  ;;  %1893 = vmatprep.subr.bf16.mxu0 %v3156_v5  ;;  %v1016_v52 = vld [vmem:[#allocation14 + $0x230] sm:$0xff]  ;;  %v1013_v4 = vld [vmem:[#allocation14 + $0x218] sm:$0xff] }
 0x361   : > { %v1017_v5 = vld [vmem:[#allocation14 + $0x238] sm:$0xff]  ;;  %v3218_v8 = vcombine.high %v1012_v49, %v1016_v52 }
 0x362   : > { %v3220_v9 = vcombine.high %v1013_v4, %v1017_v5 }
 0x363   : > { %1853 = vmatpush1.bf16.msra.mxu1 %v3153_v10  ;;  %1894 = vmatpush1.bf16.msra.mxu0 %v3155_v11  ;;  %v3217_v10 = vcombine.low %v1012_v49, %v1016_v52  ;;  %v3219_v11 = vcombine.low %v1013_v4, %v1017_v5 }
 0x364   : > { %1854 = vmatprep.subr.bf16.mxu1 %v3274_v12  ;;  %1895 = vmatprep.subr.bf16.mxu0 %v3276_v13  ;;  %v1086_v12 = vsub.s32 2, %v4664_v0  ;;  %v1074_v13 = vld [vmem:[%s4994_s27] sm:$0xff] }
 0x365   : > { %v1079_v15 = vrot.slane %v1074_v13, %v813_v1  ;;  %v1083_v18 = vrot.slane %v1074_v13, %v817_v3  ;;  %v1094_v3 = vsub.s32 4, %v4664_v0 }
 0x366   : > { %v1087_v17 = vrot.slane %v1074_v13, %v1086_v12 }
 0x367   : > { %1855 = vmatpush2.bf16.msra.mxu1 %v3273_v19  ;;  %1896 = vmatpush2.bf16.msra.mxu0 %v3275_v20  ;;  %v1091_v19 = vrot.slane %v1074_v13, %v1090_v14 }
 0x368   : > { %1856 = vmatprep.subr.bf16.mxu1 %v3266_v21  ;;  %1897 = vmatprep.subr.bf16.mxu0 %v3268_v22 }
 0x36b   : > { %1857 = vmatpush2.bf16.msra.mxu1 %v3265_v27  ;;  %1898 = vmatpush2.bf16.msra.mxu0 %v3267_v28 }
 0x36c   : > { %1858 = vmatprep.subr.bf16.mxu1 %v3258_v29  ;;  %1899 = vmatprep.subr.bf16.mxu0 %v3260_v30 }
 0x36f   : > { %1859 = vmatpush2.bf16.msra.mxu1 %v3257_v35  ;;  %1900 = vmatpush2.bf16.msra.mxu0 %v3259_v36  ;;  %v1098_v35 = vsub.s32 5, %v4664_v0  ;;  %v1106_v36 = vsub.s32 7, %v4664_v0 }
 0x370   : > { %1860 = vmatprep.subr.bf16.mxu1 %v3250_v37  ;;  %1901 = vmatprep.subr.bf16.mxu0 %v3252_v38  ;;  %v1095_v37 = vrot.slane %v1074_v13, %v1094_v3  ;;  %v1103_v38 = vrot.slane %v1074_v13, %v1102_v34 }
 0x371   : > { %v1099_v39 = vrot.slane %v1074_v13, %v1098_v35  ;;  %v1107_v40 = vrot.slane %v1074_v13, %v1106_v36 }
 0x373   : > { %1861 = vmatpush2.bf16.msra.mxu1 %v3249_v43  ;;  %1902 = vmatpush2.bf16.msra.mxu0 %v3251_v44 }
 0x374   : > { %1862 = vmatprep.subr.bf16.mxu1 %v3242_v45  ;;  %1903 = vmatprep.subr.bf16.mxu0 %v3244_v47 }
 0x377   : > { %1863 = vmatpush2.bf16.msra.mxu1 %v3241_v54  ;;  %1904 = vmatpush2.bf16.msra.mxu0 %v3243_v55 }
 0x378   : > { %1864 = vmatprep.subr.bf16.mxu1 %v3234_v56  ;;  %1905 = vmatprep.subr.bf16.mxu0 %v3236_v57 }
 0x37b   : > { %1865 = vmatpush2.bf16.msra.mxu1 %v3233_v62  ;;  %1906 = vmatpush2.bf16.msra.mxu0 %v3235_v63 }
 0x37c   : > { %1866 = vmatprep.subr.bf16.mxu1 %v3226_v2  ;;  %1907 = vmatprep.subr.bf16.mxu0 %v3228_v46 }
 0x37f   : > { %1867 = vmatpush2.bf16.msra.mxu1 %v3225_v6  ;;  %1908 = vmatpush2.bf16.msra.mxu0 %v3227_v7 }
 0x380   : > { %1868 = vmatprep.subr.bf16.mxu1 %v3218_v8  ;;  %1909 = vmatprep.subr.bf16.mxu0 %v3220_v9 }
 0x383   : > { %1869 = vmatpush2.bf16.msra.mxu1 %v3217_v10  ;;  %1910 = vmatpush2.bf16.msra.mxu0 %v3219_v11 }
 0x386   : > { %1871 = vmatmul.mubr.bf16.vlgmr.msra.gmra.mxu1 %v4675_v16  ;;  %1912 = vmatmul.mubr.bf16.vlgmr.msra.gmra.mxu0 %v4675_v16 }
 0x406   : > { %v1790_v20 = vpop.f32.mrf.mxu1  ;;  %v1831_v21 = vpop.f32.mrf.mxu0 }
 0x407   : > { %v1791_v22 = vadd.f32 %v1790_v20, %v1079_v15  ;;  %v1832_v16 = vadd.f32 %v1831_v21, %v1087_v17 }
 0x408   : > { %v1792_v23 = vpop.f32.mrf.mxu1  ;;  %v1833_v24 = vpop.f32.mrf.mxu0 }
 0x409   : > { %v1920_v25 = vmax.f32 %v1791_v22, 0.0  ;;  %v1922_v26 = vmax.f32 %v1832_v16, 0.0  ;;  %v1793_v27 = vadd.f32 %v1792_v23, %v1083_v18  ;;  %v1834_v28 = vadd.f32 %v1833_v24, %v1091_v19 }
 0x40a   : > { %v1794_v29 = vpop.f32.mrf.mxu1  ;;  %v1835_v30 = vpop.f32.mrf.mxu0 }
 0x40b   : > { %1928 = vst [vmem:[#allocation2 + $0x30] sm:$0xff] %v1920_v25  ;;  %1930 = vst [vmem:[#allocation2 + $0x18] sm:$0xff] %v1922_v26  ;;  %v1921_v1 = vmax.f32 %v1793_v27, 0.0  ;;  %v1923_v31 = vmax.f32 %v1834_v28, 0.0 }
 0x40c   : > { %v1795_v32 = vpop.f32.mrf.mxu1  ;;  %v1836_v33 = vpop.f32.mrf.mxu0 }
 0x40d   : > { %1929 = vst [vmem:[#allocation2] sm:$0xff] %v1921_v1  ;;  %1931 = vst [vmem:[#allocation2 + $0x10] sm:$0xff] %v1923_v31 }
 0x446   : > { %v1872_v41 = vpop.f32.mrf.mxu1  ;;  %v1913_v42 = vpop.f32.mrf.mxu0 }
 0x447   : > { %v1873_v43 = vadd.f32 %v1872_v41, %v1095_v37  ;;  %v1914_v44 = vadd.f32 %v1913_v42, %v1103_v38 }
 0x448   : > { %v1874_v45 = vpop.f32.mrf.mxu1  ;;  %v1915_v47 = vpop.f32.mrf.mxu0 }
 0x449   : > { %v1924_v48 = vmax.f32 %v1873_v43, 0.0  ;;  %v1926_v50 = vmax.f32 %v1914_v44, 0.0  ;;  %v1875_v51 = vadd.f32 %v1874_v45, %v1099_v39  ;;  %v1916_v53 = vadd.f32 %v1915_v47, %v1107_v40 }
 0x44a   : > { %v1876_v54 = vpop.f32.mrf.mxu1  ;;  %v1917_v55 = vpop.f32.mrf.mxu0 }
 0x44b   : > { %1932 = vst [vmem:[#allocation2 + $0x8] sm:$0xff] %v1924_v48  ;;  %1934 = vst [vmem:[#allocation2 + $0x28] sm:$0xff] %v1926_v50  ;;  %v1925_v56 = vmax.f32 %v1875_v51, 0.0  ;;  %v1927_v0 = vmax.f32 %v1916_v53, 0.0 }
 0x44c   : > { %v1877_v57 = vpop.f32.mrf.mxu1  ;;  %v1918_v58 = vpop.f32.mrf.mxu0 }
 0x44d   : > { %1933 = vst [vmem:[#allocation2 + $0x20] sm:$0xff] %v1925_v56  ;;  %1935 = vst [vmem:[#allocation2 + $0x38] sm:$0xff] %v1927_v0 }
 0x44e PF: > { %v3712_v59 = vld [vmem:[%s4628_s2 + $0x74] ss:$8 sps:$4 sm:$0xff]   ;;  %v3716_v61 = vld [vmem:[%s4628_s2 + $0x70] ss:$8 sps:$4 sm:$0xff]   ;;  %v3718_v63 = vld [vmem:[%s4628_s2 + $0x64] ss:$8 sps:$4 sm:$0xff]  }
 0x44f   : > { %v3714_v60 = vld [vmem:[%s4628_s2 + $0x174] ss:$8 sps:$4 sm:$0xff]   ;;  %2732 = vmatprep.subr.bf16.mxu0 %v3712_v59  ;;  %v3717_v62 = vld [vmem:[%s4628_s2 + $0x170] ss:$8 sps:$4 sm:$0xff]   ;;  %v3720_v2 = vld [vmem:[%s4628_s2 + $0x164] ss:$8 sps:$4 sm:$0xff]  }
 0x450   : > { %2773 = vmatprep.subr.bf16.mxu1 %v3714_v60  ;;  %2733 = vmatpush1.bf16.msra.mxu0 %v3716_v61  ;;  %v3722_v46 = vld [vmem:[%s4628_s2 + $0x60] ss:$8 sps:$4 sm:$0xff]   ;;  %v3724_v52 = vld [vmem:[%s4628_s2 + $0x54] ss:$8 sps:$4 sm:$0xff]   ;;  %v3728_v5 = vld [vmem:[%s4628_s2 + $0x50] ss:$8 sps:$4 sm:$0xff]  }
 0x451   : > { %2774 = vmatpush1.bf16.msra.mxu1 %v3717_v62  ;;  %2734 = vmatprep.subr.bf16.mxu0 %v3718_v63  ;;  %v3723_v49 = vld [vmem:[%s4628_s2 + $0x160] ss:$8 sps:$4 sm:$0xff]   ;;  %v3726_v4 = vld [vmem:[%s4628_s2 + $0x154] ss:$8 sps:$4 sm:$0xff]   ;;  %v3729_v6 = vld [vmem:[%s4628_s2 + $0x150] ss:$8 sps:$4 sm:$0xff]  }
 0x452   : > { %2775 = vmatprep.subr.bf16.mxu1 %v3720_v2  ;;  %v3730_v7 = vld [vmem:[%s4628_s2 + $0x44] ss:$8 sps:$4 sm:$0xff]   ;;  %v3734_v9 = vld [vmem:[%s4628_s2 + $0x40] ss:$8 sps:$4 sm:$0xff]   ;;  %v3736_v11 = vld [vmem:[%s4628_s2 + $0x34] ss:$8 sps:$4 sm:$0xff]  }
 0x453   : > { %v3732_v8 = vld [vmem:[%s4628_s2 + $0x144] ss:$8 sps:$4 sm:$0xff]   ;;  %v3735_v10 = vld [vmem:[%s4628_s2 + $0x140] ss:$8 sps:$4 sm:$0xff]   ;;  %v3738_v12 = vld [vmem:[%s4628_s2 + $0x134] ss:$8 sps:$4 sm:$0xff]  }
 0x454   : > { %2735 = vmatpush1.bf16.msra.mxu0 %v3722_v46  ;;  %v3740_v13 = vld [vmem:[%s4628_s2 + $0x30] ss:$8 sps:$4 sm:$0xff]   ;;  %v3742_v15 = vld [vmem:[%s4628_s2 + $0x24] ss:$8 sps:$4 sm:$0xff]   ;;  %v3746_v18 = vld [vmem:[%s4628_s2 + $0x20] ss:$8 sps:$4 sm:$0xff]  }
 0x455   : > { %2776 = vmatpush1.bf16.msra.mxu1 %v3723_v49  ;;  %2736 = vmatprep.subr.bf16.mxu0 %v3724_v52  ;;  %v3741_v14 = vld [vmem:[%s4628_s2 + $0x130] ss:$8 sps:$4 sm:$0xff]   ;;  %v3744_v17 = vld [vmem:[%s4628_s2 + $0x124] ss:$8 sps:$4 sm:$0xff]   ;;  %v3747_v19 = vld [vmem:[%s4628_s2 + $0x120] ss:$8 sps:$4 sm:$0xff]  }
 0x456   : > { %2777 = vmatprep.subr.bf16.mxu1 %v3726_v4  ;;  %v3748_v20 = vld [vmem:[%s4628_s2 + $0x14] ss:$8 sps:$4 sm:$0xff]   ;;  %v3752_v22 = vld [vmem:[%s4628_s2 + $0x10] ss:$8 sps:$4 sm:$0xff]   ;;  %v3754_v23 = vld [vmem:[%s4628_s2 + $0x4] ss:$8 sps:$4 sm:$0xff]  }
 0x457   : > { %v3750_v21 = vld [vmem:[%s4628_s2 + $0x114] ss:$8 sps:$4 sm:$0xff]   ;;  %v3753_v16 = vld [vmem:[%s4628_s2 + $0x110] ss:$8 sps:$4 sm:$0xff]   ;;  %v3756_v24 = vld [vmem:[%s4628_s2 + $0x104] ss:$8 sps:$4 sm:$0xff]  }
 0x458   : > { %2737 = vmatpush1.bf16.msra.mxu0 %v3728_v5  ;;  %v3758_v25 = vld [vmem:[%s4628_s2] ss:$8 sps:$4 sm:$0xff]   ;;  %v3760_v27 = vld [vmem:[%s4628_s2 + $0xf4] ss:$8 sps:$4 sm:$0xff]   ;;  %v3764_v29 = vld [vmem:[%s4628_s2 + $0xf0] ss:$8 sps:$4 sm:$0xff]  }
 0x459   : > { %2778 = vmatpush1.bf16.msra.mxu1 %v3729_v6  ;;  %2738 = vmatprep.subr.bf16.mxu0 %v3730_v7  ;;  %v3759_v26 = vld [vmem:[%s4628_s2 + $0x100] ss:$8 sps:$4 sm:$0xff]   ;;  %v3762_v28 = vld [vmem:[%s4628_s2 + $0x1f4] ss:$8 sps:$4 sm:$0xff]   ;;  %v3765_v30 = vld [vmem:[%s4628_s2 + $0x1f0] ss:$8 sps:$4 sm:$0xff]  }
 0x45a   : > { %2779 = vmatprep.subr.bf16.mxu1 %v3732_v8  ;;  %v3766_v1 = vld [vmem:[%s4628_s2 + $0xe4] ss:$8 sps:$4 sm:$0xff]   ;;  %v3770_v32 = vld [vmem:[%s4628_s2 + $0xe0] ss:$8 sps:$4 sm:$0xff]   ;;  %v3772_v3 = vld [vmem:[%s4628_s2 + $0xd4] ss:$8 sps:$4 sm:$0xff]  }
 0x45b   : > { %v3768_v31 = vld [vmem:[%s4628_s2 + $0x1e4] ss:$8 sps:$4 sm:$0xff]   ;;  %v3771_v33 = vld [vmem:[%s4628_s2 + $0x1e0] ss:$8 sps:$4 sm:$0xff]   ;;  %v3774_v34 = vld [vmem:[%s4628_s2 + $0x1d4] ss:$8 sps:$4 sm:$0xff]  }
 0x45c   : > { %2739 = vmatpush1.bf16.msra.mxu0 %v3734_v9  ;;  %v3776_v35 = vld [vmem:[%s4628_s2 + $0xd0] ss:$8 sps:$4 sm:$0xff]   ;;  %v3778_v37 = vld [vmem:[%s4628_s2 + $0xc4] ss:$8 sps:$4 sm:$0xff]   ;;  %v3782_v40 = vld [vmem:[%s4628_s2 + $0xc0] ss:$8 sps:$4 sm:$0xff]  }
 0x45d   : > { %2780 = vmatpush1.bf16.msra.mxu1 %v3735_v10  ;;  %2740 = vmatprep.subr.bf16.mxu0 %v3736_v11  ;;  %v3777_v36 = vld [vmem:[%s4628_s2 + $0x1d0] ss:$8 sps:$4 sm:$0xff]   ;;  %v3780_v38 = vld [vmem:[%s4628_s2 + $0x1c4] ss:$8 sps:$4 sm:$0xff]   ;;  %v3783_v41 = vld [vmem:[%s4628_s2 + $0x1c0] ss:$8 sps:$4 sm:$0xff]  }
 0x45e   : > { %2781 = vmatprep.subr.bf16.mxu1 %v3738_v12  ;;  %v1937_v39 = vld [vmem:[#allocation2] sm:$0xff]  ;;  %v1939_v43 = vld [vmem:[#allocation2 + $0x10] sm:$0xff]  ;;  %v1938_v2 = vld [vmem:[#allocation2 + $0x18] sm:$0xff]  ;;  %s4995_s6 = sld [smem:[#allocation27_spill]]  ;;  %s2915_s4 = sshll.u32 %s4648_s9, 4  ;;  %s4836_s4 = int_to_ptr.vmem [resolvable:$true] %s2915_s4 }
 0x45f   : > { %v1945_v42 = vpack.c.bf16 %v1937_v39, %v1937_v39  ;;  %v3784_v44 = vld [vmem:[%s4628_s2 + $0xb4] ss:$8 sps:$4 sm:$0xff]   ;;  %v1947_v45 = vpack.c.bf16 %v1939_v43, %v1939_v43  ;;  %v3788_v48 = vld [vmem:[%s4628_s2 + $0xb0] ss:$8 sps:$4 sm:$0xff]   ;;  %v3790_v51 = vld [vmem:[%s4628_s2 + $0xa4] ss:$8 sps:$4 sm:$0xff]   ;;  %v1946_v4 = vpack.c.bf16 %v1938_v2, %v1938_v2 }
 0x460   : > { %2741 = vmatpush1.bf16.msra.mxu0 %v3740_v13  ;;  %v3786_v47 = vld [vmem:[%s4628_s2 + $0x1b4] ss:$8 sps:$4 sm:$0xff]   ;;  %v3789_v50 = vld [vmem:[%s4628_s2 + $0x1b0] ss:$8 sps:$4 sm:$0xff]   ;;  %v3792_v53 = vld [vmem:[%s4628_s2 + $0x1a4] ss:$8 sps:$4 sm:$0xff]  }
 0x461   : > { %2782 = vmatpush1.bf16.msra.mxu1 %v3741_v14  ;;  %2742 = vmatprep.subr.bf16.mxu0 %v3742_v15  ;;  %v3794_v54 = vld [vmem:[%s4628_s2 + $0xa0] ss:$8 sps:$4 sm:$0xff]   ;;  %v3796_v56 = vld [vmem:[%s4628_s2 + $0x94] ss:$8 sps:$4 sm:$0xff]   ;;  %v3800_v57 = vld [vmem:[%s4628_s2 + $0x90] ss:$8 sps:$4 sm:$0xff]  }
 0x462   : > { %2783 = vmatprep.subr.bf16.mxu1 %v3744_v17  ;;  %2764 = vmatprep.mubr.bf16.mxu0 %v1945_v42  ;;  %v3795_v55 = vld [vmem:[%s4628_s2 + $0x1a0] ss:$8 sps:$4 sm:$0xff]   ;;  %v3798_v0 = vld [vmem:[%s4628_s2 + $0x194] ss:$8 sps:$4 sm:$0xff]   ;;  %v3801_v58 = vld [vmem:[%s4628_s2 + $0x190] ss:$8 sps:$4 sm:$0xff]  }
 0x463   : > { %2805 = vmatprep.mubr.bf16.mxu1 %v1947_v45  ;;  %v3802_v59 = vld [vmem:[%s4628_s2 + $0x84] ss:$8 sps:$4 sm:$0xff]   ;;  %v3806_v61 = vld [vmem:[%s4628_s2 + $0x80] ss:$8 sps:$4 sm:$0xff]   ;;  %v3810_v46 = vld [vmem:[%s4628_s2 + $0x274] ss:$8 sps:$4 sm:$0xff]  }
 0x464   : > { %2743 = vmatpush1.bf16.msra.mxu0 %v3746_v18  ;;  %v3804_v60 = vld [vmem:[%s4628_s2 + $0x184] ss:$8 sps:$4 sm:$0xff]   ;;  %v3807_v62 = vld [vmem:[%s4628_s2 + $0x180] ss:$8 sps:$4 sm:$0xff]   ;;  %v3813_v49 = vld [vmem:[%s4628_s2 + $0x374] ss:$8 sps:$4 sm:$0xff]  }
 0x465   : > { %2784 = vmatpush1.bf16.msra.mxu1 %v3747_v19  ;;  %2744 = vmatprep.subr.bf16.mxu0 %v3748_v20  ;;  %v1936_v63 = vld [vmem:[#allocation2 + $0x30] sm:$0xff]  ;;  %v3808_v5 = vld [vmem:[%s4628_s2 + $0x270] ss:$8 sps:$4 sm:$0xff]   ;;  %v3816_v7 = vld [vmem:[%s4628_s2 + $0x264] ss:$8 sps:$4 sm:$0xff]   ;;  %s4116_s8 = scalar_lea.vmem %s4836_s4, 256 }
 0x466   : > { %2785 = vmatprep.subr.bf16.mxu1 %v3750_v21  ;;  %v1944_v52 = vpack.c.bf16 %v1936_v63, %v1936_v63  ;;  %v3811_v6 = vld [vmem:[%s4628_s2 + $0x370] ss:$8 sps:$4 sm:$0xff]   ;;  %v3819_v8 = vld [vmem:[%s4628_s2 + $0x364] ss:$8 sps:$4 sm:$0xff]   ;;  %v3814_v9 = vld [vmem:[%s4628_s2 + $0x260] ss:$8 sps:$4 sm:$0xff]   ;;  %p4117_p9 = scmp.ne.s32.totalorder %s4836_s4, %s4116_s8 }
 0x467   : > { %v3817_v10 = vld [vmem:[%s4628_s2 + $0x360] ss:$8 sps:$4 sm:$0xff]   ;;  %v3822_v11 = vld [vmem:[%s4628_s2 + $0x254] ss:$8 sps:$4 sm:$0xff]   ;;  %v3820_v13 = vld [vmem:[%s4628_s2 + $0x250] ss:$8 sps:$4 sm:$0xff]  }
 0x468   : > { %2745 = vmatpush1.bf16.msra.mxu0 %v3752_v22  ;;  %v3825_v12 = vld [vmem:[%s4628_s2 + $0x354] ss:$8 sps:$4 sm:$0xff]   ;;  %v3823_v14 = vld [vmem:[%s4628_s2 + $0x350] ss:$8 sps:$4 sm:$0xff]   ;;  %v3828_v15 = vld [vmem:[%s4628_s2 + $0x244] ss:$8 sps:$4 sm:$0xff]  }
 0x469   : > { %2786 = vmatpush1.bf16.msra.mxu1 %v3753_v16  ;;  %2746 = vmatprep.subr.bf16.mxu0 %v3754_v23  ;;  %v3831_v17 = vld [vmem:[%s4628_s2 + $0x344] ss:$8 sps:$4 sm:$0xff]   ;;  %v3826_v18 = vld [vmem:[%s4628_s2 + $0x240] ss:$8 sps:$4 sm:$0xff]   ;;  %v3834_v20 = vld [vmem:[%s4628_s2 + $0x234] ss:$8 sps:$4 sm:$0xff]  }
 0x46a   : > { %2787 = vmatprep.subr.bf16.mxu1 %v3756_v24  ;;  %v3829_v19 = vld [vmem:[%s4628_s2 + $0x340] ss:$8 sps:$4 sm:$0xff]   ;;  %v3837_v21 = vld [vmem:[%s4628_s2 + $0x334] ss:$8 sps:$4 sm:$0xff]   ;;  %v3832_v22 = vld [vmem:[%s4628_s2 + $0x230] ss:$8 sps:$4 sm:$0xff]  }
 0x46b   : > { %v3835_v16 = vld [vmem:[%s4628_s2 + $0x330] ss:$8 sps:$4 sm:$0xff]   ;;  %v3840_v23 = vld [vmem:[%s4628_s2 + $0x224] ss:$8 sps:$4 sm:$0xff]   ;;  %v3862_v43 = vld [vmem:[%s4628_s2 + $0x2e0] ss:$8 sps:$4 sm:$0xff]  }
 0x46c   : > { %2747 = vmatpush1.bf16.msra.mxu0 %v3758_v25  ;;  %v3843_v24 = vld [vmem:[%s4628_s2 + $0x324] ss:$8 sps:$4 sm:$0xff]   ;;  %v3838_v25 = vld [vmem:[%s4628_s2 + $0x220] ss:$8 sps:$4 sm:$0xff]   ;;  %v3856_v39 = vld [vmem:[%s4628_s2 + $0x2f0] ss:$8 sps:$4 sm:$0xff]  }
 0x46d   : > { %2788 = vmatpush1.bf16.msra.mxu1 %v3759_v26  ;;  %2748 = vmatprep.subr.bf16.mxu0 %v3760_v27  ;;  %v3841_v26 = vld [vmem:[%s4628_s2 + $0x320] ss:$8 sps:$4 sm:$0xff]   ;;  %v3846_v27 = vld [vmem:[%s4628_s2 + $0x214] ss:$8 sps:$4 sm:$0xff]   ;;  %v3867_v42 = vld [vmem:[%s4628_s2 + $0x3e4] ss:$8 sps:$4 sm:$0xff]  }
 0x46e   : > { %2789 = vmatprep.subr.bf16.mxu1 %v3762_v28  ;;  %v3849_v28 = vld [vmem:[%s4628_s2 + $0x314] ss:$8 sps:$4 sm:$0xff]   ;;  %p4998_p1 = scmp.ne.s32.totalorder %s4979_s23, 0  ;;  %s4296_s10 = smov [#allocation17]  }
 0x46f   : > { %v3870_v45 = vld [vmem:[%s4628_s2 + $0x2d4] ss:$8 sps:$4 sm:$0xff]   ;;  %s4120_s15 = sshll.u32 %s4296_s10, 4  ;;  %s4121_s15 = int_to_ptr.vmem [resolvable:$false] %s4120_s15 }
 0x470   : > { %2749 = vmatpush2.bf16.msra.mxu0 %v3764_v29  ;;  %v1941_v29 = vld [vmem:[#allocation2 + $0x20] sm:$0xff]  ;;  %v3894_v63 = vld [vmem:[%s4628_s2 + $0x294] ss:$8 sps:$4 sm:$0xff]   ;;  %p4118_p11 = pnand %p4117_p9, %p4998_p1  ;;  %s4122_s14 = scalar_lea.vmem %s4121_s15, 512 }
 0x471   : > { %2790 = vmatpush2.bf16.msra.mxu1 %v3765_v30  ;;  %2750 = vmatprep.subr.bf16.mxu0 %v3766_v1  ;;  %v1949_v30 = vpack.c.bf16 %v1941_v29, %v1941_v29  ;;  %v1943_v1 = vld [vmem:[#allocation2 + $0x38] sm:$0xff]  ;;  %v3897_v2 = vld [vmem:[%s4628_s2 + $0x394] ss:$8 sps:$4 sm:$0xff]   ;;  %p4123_p5 = scmp.lt.s32.totalorder %s4836_s4, %s4121_s15  ;;  %p4124_p8 = scmp.lt.s32.totalorder %s4122_s14, %s4116_s8 }
 0x472   : > { %2791 = vmatprep.subr.bf16.mxu1 %v3768_v31  ;;  %v3844_v31 = vld [vmem:[%s4628_s2 + $0x210] ss:$8 sps:$4 sm:$0xff]   ;;  %p4119_p7 = pneg %p4118_p11 }
 0x473   : > { %p4125_p10 = por %p4124_p8, %p4123_p5 }
 0x474   : > { %2751 = vmatpush2.bf16.msra.mxu0 %v3770_v32  ;;  %v3847_v32 = vld [vmem:[%s4628_s2 + $0x310] ss:$8 sps:$4 sm:$0xff]  }
 0x475   : > { %2792 = vmatpush2.bf16.msra.mxu1 %v3771_v33  ;;  %2752 = vmatprep.subr.bf16.mxu0 %v3772_v3  ;;  %v1951_v33 = vpack.c.bf16 %v1943_v1, %v1943_v1  ;;  %v3852_v3 = vld [vmem:[%s4628_s2 + $0x204] ss:$8 sps:$4 sm:$0xff]   ;;  %p4126_p6 = pnand %p4125_p10, %p4119_p7 }
 0x476   : > { %2793 = vmatprep.subr.bf16.mxu1 %v3774_v34  ;;  %v3855_v34 = vld [vmem:[%s4628_s2 + $0x304] ss:$8 sps:$4 sm:$0xff]  }
 0x478   : > { %2753 = vmatpush2.bf16.msra.mxu0 %v3776_v35  ;;  %v3850_v35 = vld [vmem:[%s4628_s2 + $0x200] ss:$8 sps:$4 sm:$0xff]  }
 0x479   : > { %2794 = vmatpush2.bf16.msra.mxu1 %v3777_v36  ;;  %2754 = vmatprep.subr.bf16.mxu0 %v3778_v37  ;;  %v3853_v36 = vld [vmem:[%s4628_s2 + $0x300] ss:$8 sps:$4 sm:$0xff]   ;;  %v3858_v37 = vld [vmem:[%s4628_s2 + $0x2f4] ss:$8 sps:$4 sm:$0xff]  }
 0x47a   : > { %2795 = vmatprep.subr.bf16.mxu1 %v3780_v38  ;;  %v3861_v38 = vld [vmem:[%s4628_s2 + $0x3f4] ss:$8 sps:$4 sm:$0xff]  }
 0x47c   : > { %2755 = vmatpush2.bf16.msra.mxu0 %v3782_v40  ;;  %v3859_v40 = vld [vmem:[%s4628_s2 + $0x3f0] ss:$8 sps:$4 sm:$0xff]  }
 0x47d   : > { %2796 = vmatpush2.bf16.msra.mxu1 %v3783_v41  ;;  %2756 = vmatprep.subr.bf16.mxu0 %v3784_v44  ;;  %v3864_v41 = vld [vmem:[%s4628_s2 + $0x2e4] ss:$8 sps:$4 sm:$0xff]   ;;  %v3865_v44 = vld [vmem:[%s4628_s2 + $0x3e0] ss:$8 sps:$4 sm:$0xff]  }
 0x47e   : > { %2797 = vmatprep.subr.bf16.mxu1 %v3786_v47  ;;  %v3873_v47 = vld [vmem:[%s4628_s2 + $0x3d4] ss:$8 sps:$4 sm:$0xff]  }
 0x480   : > { %2757 = vmatpush2.bf16.msra.mxu0 %v3788_v48  ;;  %v3868_v48 = vld [vmem:[%s4628_s2 + $0x2d0] ss:$8 sps:$4 sm:$0xff]  }
 0x481   : > { %2798 = vmatpush2.bf16.msra.mxu1 %v3789_v50  ;;  %2758 = vmatprep.subr.bf16.mxu0 %v3790_v51  ;;  %v3871_v50 = vld [vmem:[%s4628_s2 + $0x3d0] ss:$8 sps:$4 sm:$0xff]   ;;  %v3876_v51 = vld [vmem:[%s4628_s2 + $0x2c4] ss:$8 sps:$4 sm:$0xff]  }
 0x482   : > { %2799 = vmatprep.subr.bf16.mxu1 %v3792_v53  ;;  %v3879_v53 = vld [vmem:[%s4628_s2 + $0x3c4] ss:$8 sps:$4 sm:$0xff]  }
 0x484   : > { %2759 = vmatpush2.bf16.msra.mxu0 %v3794_v54  ;;  %v3874_v54 = vld [vmem:[%s4628_s2 + $0x2c0] ss:$8 sps:$4 sm:$0xff]  }
 0x485   : > { %2800 = vmatpush2.bf16.msra.mxu1 %v3795_v55  ;;  %2760 = vmatprep.subr.bf16.mxu0 %v3796_v56  ;;  %v3877_v55 = vld [vmem:[%s4628_s2 + $0x3c0] ss:$8 sps:$4 sm:$0xff]   ;;  %v3882_v56 = vld [vmem:[%s4628_s2 + $0x2b4] ss:$8 sps:$4 sm:$0xff]  }
 0x486   : > { %2801 = vmatprep.subr.bf16.mxu1 %v3798_v0  ;;  %v3885_v0 = vld [vmem:[%s4628_s2 + $0x3b4] ss:$8 sps:$4 sm:$0xff]  }
 0x488   : > { %2761 = vmatpush2.bf16.msra.mxu0 %v3800_v57  ;;  %v3880_v57 = vld [vmem:[%s4628_s2 + $0x2b0] ss:$8 sps:$4 sm:$0xff]  }
 0x489   : > { %2802 = vmatpush2.bf16.msra.mxu1 %v3801_v58  ;;  %2762 = vmatprep.subr.bf16.mxu0 %v3802_v59  ;;  %v3883_v58 = vld [vmem:[%s4628_s2 + $0x3b0] ss:$8 sps:$4 sm:$0xff]   ;;  %v3888_v59 = vld [vmem:[%s4628_s2 + $0x2a4] ss:$8 sps:$4 sm:$0xff]  }
 0x48a   : > { %2803 = vmatprep.subr.bf16.mxu1 %v3804_v60  ;;  %v3891_v60 = vld [vmem:[%s4628_s2 + $0x3a4] ss:$8 sps:$4 sm:$0xff]  }
 0x48c   : > { %2763 = vmatpush2.bf16.msra.mxu0 %v3806_v61  ;;  %v3886_v61 = vld [vmem:[%s4628_s2 + $0x2a0] ss:$8 sps:$4 sm:$0xff]  }
 0x48d   : > { %2804 = vmatpush2.bf16.msra.mxu1 %v3807_v62  ;;  %2814 = vmatprep.subr.bf16.mxu0 %v3810_v46  ;;  %v3889_v62 = vld [vmem:[%s4628_s2 + $0x3a0] ss:$8 sps:$4 sm:$0xff]   ;;  %v3892_v46 = vld [vmem:[%s4628_s2 + $0x290] ss:$8 sps:$4 sm:$0xff]  }
 0x48e   : > { %2855 = vmatprep.subr.bf16.mxu1 %v3813_v49  ;;  %v3895_v49 = vld [vmem:[%s4628_s2 + $0x390] ss:$8 sps:$4 sm:$0xff]  }
 0x48f   : > { %2765 = vmatmul.mubr.bf16.vlgmr.msra.gmra.mxu0 %v1944_v52  ;;  %v3900_v52 = vld [vmem:[%s4628_s2 + $0x284] ss:$8 sps:$4 sm:$0xff]  }
 0x490   : > { %2806 = vmatmul.mubr.bf16.vlgmr.msra.gmra.mxu1 %v1946_v4  ;;  %2815 = vmatpush1.bf16.msra.mxu0 %v3808_v5  ;;  %v3903_v4 = vld [vmem:[%s4628_s2 + $0x384] ss:$8 sps:$4 sm:$0xff]   ;;  %v3898_v5 = vld [vmem:[%s4628_s2 + $0x280] ss:$8 sps:$4 sm:$0xff]  }
 0x491   : > { %2856 = vmatpush1.bf16.msra.mxu1 %v3811_v6  ;;  %2816 = vmatprep.subr.bf16.mxu0 %v3816_v7  ;;  %v3901_v6 = vld [vmem:[%s4628_s2 + $0x380] ss:$8 sps:$4 sm:$0xff]   ;;  %v1940_v7 = vld [vmem:[#allocation2 + $0x8] sm:$0xff]  ;;  %s3407_s2 = sshll.u32 %s4995_s6, 2 }
 0x492   : > { %2857 = vmatprep.subr.bf16.mxu1 %v3819_v8  ;;  %2846 = vmatprep.mubr.bf16.mxu0 %v1949_v30  ;;  %v1942_v8 = vld [vmem:[#allocation2 + $0x28] sm:$0xff]  ;;  %s2911_s20 = sadd.s32 %s3407_s2, %s4636_s5  ;;  %s4997_s5 = sld [smem:[#allocation45_spill]] }
 0x493   : > { %2887 = vmatprep.mubr.bf16.mxu1 %v1951_v33  ;;  %s3408_s13 = sshll.u32 %s2911_s20, 7 }
 0x494   : > { %2817 = vmatpush1.bf16.msra.mxu0 %v3814_v9  ;;  %v1948_v9 = vpack.c.bf16 %v1940_v7, %v1940_v7 }
 0x495   : > { %2858 = vmatpush1.bf16.msra.mxu1 %v3817_v10  ;;  %2818 = vmatprep.subr.bf16.mxu0 %v3822_v11  ;;  %v1950_v10 = vpack.c.bf16 %v1942_v8, %v1942_v8 }
 0x496   : > { %2859 = vmatprep.subr.bf16.mxu1 %v3825_v12 }
 0x498   : > { %2819 = vmatpush1.bf16.msra.mxu0 %v3820_v13  ;;  %s4834_s7 = scalar_lea.hbm %s4997_s5, %s3408_s13 }
 0x499   : > { %2860 = vmatpush1.bf16.msra.mxu1 %v3823_v14  ;;  %2820 = vmatprep.subr.bf16.mxu0 %v3828_v15 }
 0x49a   : > { %2861 = vmatprep.subr.bf16.mxu1 %v3831_v17 }
 0x49c   : > { %2821 = vmatpush1.bf16.msra.mxu0 %v3826_v18 }
 0x49d   : > { %2862 = vmatpush1.bf16.msra.mxu1 %v3829_v19  ;;  %2822 = vmatprep.subr.bf16.mxu0 %v3834_v20  ;;  %v2082_v20 = vlaneseq }
 0x49e   : > { %2863 = vmatprep.subr.bf16.mxu1 %v3837_v21 }
 0x49f   : > { %v2083_v21 = vshrl.u32 %v2082_v20, 7 }
 0x4a0   : > { %2823 = vmatpush1.bf16.msra.mxu0 %v3832_v22 }
 0x4a1   : > { %2864 = vmatpush1.bf16.msra.mxu1 %v3835_v16  ;;  %2824 = vmatprep.subr.bf16.mxu0 %v3840_v23  ;;  %v2084_v22 = vsub.s32 0, %v2083_v21  ;;  %v2080_v16 = vld [vmem:[%s557_s29] sm:$0x3]  ;;  %v2088_v23 = vsub.s32 1, %v2083_v21  ;;  %s2899_s29 = scalar_lea.sflag [#allocation5], %s550_s16 }
 0x4a2   : > { %2865 = vmatprep.subr.bf16.mxu1 %v3843_v24 }
 0x4a3   : > { %v2085_v24 = vrot.slane %v2080_v16, %v2084_v22 }
 0x4a4   : > { %2825 = vmatpush1.bf16.msra.mxu0 %v3838_v25  ;;  %v2089_v25 = vrot.slane %v2080_v16, %v2088_v23 }
 0x4a5   : > { %2866 = vmatpush1.bf16.msra.mxu1 %v3841_v26  ;;  %2826 = vmatprep.subr.bf16.mxu0 %v3846_v27 }
 0x4a6   : > { %2867 = vmatprep.subr.bf16.mxu1 %v3849_v28 }
 0x4a8   : > { %2827 = vmatpush1.bf16.msra.mxu0 %v3844_v31 }
 0x4a9   : > { %2868 = vmatpush1.bf16.msra.mxu1 %v3847_v32  ;;  %2828 = vmatprep.subr.bf16.mxu0 %v3852_v3 }
 0x4aa   : > { %2869 = vmatprep.subr.bf16.mxu1 %v3855_v34 }
 0x4ac   : > { %2829 = vmatpush1.bf16.msra.mxu0 %v3850_v35 }
 0x4ad   : > { %2870 = vmatpush1.bf16.msra.mxu1 %v3853_v36  ;;  %2830 = vmatprep.subr.bf16.mxu0 %v3858_v37 }
 0x4ae   : > { %2871 = vmatprep.subr.bf16.mxu1 %v3861_v38 }
 0x4b0   : > { %2831 = vmatpush2.bf16.msra.mxu0 %v3856_v39 }
 0x4b1   : > { %2872 = vmatpush2.bf16.msra.mxu1 %v3859_v40  ;;  %2832 = vmatprep.subr.bf16.mxu0 %v3864_v41 }
 0x4b2   : > { %2873 = vmatprep.subr.bf16.mxu1 %v3867_v42 }
 0x4b4   : > { %2833 = vmatpush2.bf16.msra.mxu0 %v3862_v43 }
 0x4b5   : > { %2874 = vmatpush2.bf16.msra.mxu1 %v3865_v44  ;;  %2834 = vmatprep.subr.bf16.mxu0 %v3870_v45 }
 0x4b6   : > { %2875 = vmatprep.subr.bf16.mxu1 %v3873_v47 }
 0x4b8   : > { %2835 = vmatpush2.bf16.msra.mxu0 %v3868_v48 }
 0x4b9   : > { %2876 = vmatpush2.bf16.msra.mxu1 %v3871_v50  ;;  %2836 = vmatprep.subr.bf16.mxu0 %v3876_v51 }
 0x4ba   : > { %2877 = vmatprep.subr.bf16.mxu1 %v3879_v53 }
 0x4bc   : > { %2837 = vmatpush2.bf16.msra.mxu0 %v3874_v54 }
 0x4bd   : > { %2878 = vmatpush2.bf16.msra.mxu1 %v3877_v55  ;;  %2838 = vmatprep.subr.bf16.mxu0 %v3882_v56 }
 0x4be   : > { %2879 = vmatprep.subr.bf16.mxu1 %v3885_v0 }
 0x4c0   : > { %2839 = vmatpush2.bf16.msra.mxu0 %v3880_v57 }
 0x4c1   : > { %2880 = vmatpush2.bf16.msra.mxu1 %v3883_v58  ;;  %2840 = vmatprep.subr.bf16.mxu0 %v3888_v59 }
 0x4c2   : > { %2881 = vmatprep.subr.bf16.mxu1 %v3891_v60 }
 0x4c4   : > { %2841 = vmatpush2.bf16.msra.mxu0 %v3886_v61 }
 0x4c5   : > { %2882 = vmatpush2.bf16.msra.mxu1 %v3889_v62  ;;  %2842 = vmatprep.subr.bf16.mxu0 %v3894_v63 }
 0x4c6   : > { %2883 = vmatprep.subr.bf16.mxu1 %v3897_v2 }
 0x4c8   : > { %2843 = vmatpush2.bf16.msra.mxu0 %v3892_v46 }
 0x4c9   : > { %2884 = vmatpush2.bf16.msra.mxu1 %v3895_v49  ;;  %2844 = vmatprep.subr.bf16.mxu0 %v3900_v52 }
 0x4ca   : > { %2885 = vmatprep.subr.bf16.mxu1 %v3903_v4 }
 0x4cc   : > { %2845 = vmatpush2.bf16.msra.mxu0 %v3898_v5 }
 0x4cd   : > { %2886 = vmatpush2.bf16.msra.mxu1 %v3901_v6 }
 0x4cf   : > { %2847 = vmatmul.mubr.bf16.vlgmr.msra.gmra.mxu0 %v1948_v9 }
 0x4d0   : > { %2888 = vmatmul.mubr.bf16.vlgmr.msra.gmra.mxu1 %v1950_v10 }
 0x54f   : > { %v2766_v11 = vpop.f32.mrf.mxu0 }
 0x550   : > { %v2807_v12 = vpop.f32.mrf.mxu1  ;;  %v2767_v26 = vadd.f32 %v2766_v11, %v2085_v24 }
 0x551   : > { %v2768_v13 = vpop.f32.mrf.mxu0 }
 0x552   : > { %v2809_v14 = vpop.f32.mrf.mxu1  ;;  %v2769_v27 = vadd.f32 %v2768_v13, %v2089_v25  ;;  %v2808_v28 = vadd.f32 %v2807_v12, %v2767_v26 }
 0x553   : > { %v2770_v15 = vpop.f32.mrf.mxu0 }
 0x554   : > { %v2811_v17 = vpop.f32.mrf.mxu1  ;;  %v2810_v1 = vadd.f32 %v2809_v14, %v2769_v27 }
 0x555   : > { %v2771_v18 = vpop.f32.mrf.mxu0 }
 0x556   : > { %v2812_v19 = vpop.f32.mrf.mxu1 }
 0x58f   : > { %v2848_v29 = vpop.f32.mrf.mxu0 }
 0x590   : > { %v2889_v30 = vpop.f32.mrf.mxu1  ;;  %v2849_v31 = vadd.f32 %v2848_v29, %v2808_v28 }
 0x591   : > { %v2850_v32 = vpop.f32.mrf.mxu0 }
 0x592   : > { %v2891_v33 = vpop.f32.mrf.mxu1  ;;  %v2890_v3 = vadd.f32 %v2889_v30, %v2849_v31  ;;  %v2851_v34 = vadd.f32 %v2850_v32, %v2810_v1 }
 0x593   : > { %v2852_v35 = vpop.f32.mrf.mxu0 }
 0x594   : > { %v2893_v36 = vpop.f32.mrf.mxu1  ;;  %2896 = vst [vmem:[%s4648_s9] sm:$0xff] %v2890_v3  ;;  %v2892_v37 = vadd.f32 %v2891_v33, %v2851_v34 }
 0x595   : > { %v2853_v38 = vpop.f32.mrf.mxu0 }
 0x596   : > { %v2894_v39 = vpop.f32.mrf.mxu1  ;;  %2897 = vst [vmem:[%s4648_s9 + $0x8] sm:$0xff] %v2892_v37 }
 0x597   : > { %4129 = shalt.err (!%p4126_p6)
}
 0x598   : > { %s4130_s9 = scalar_lea.hbm %s4834_s7, 256  ;;  %s4134_s27 = scalar_lea.hbm %s4997_s5, 1536 }
 0x599   : > { %p4131_p13 = scmp.ne.s32.totalorder %s4834_s7, %s4130_s9  ;;  %p4135_p3 = scmp.lt.s32.totalorder %s4834_s7, %s4997_s5 }
 0x59a   : > { %p4136_p4 = scmp.lt.s32.totalorder %s4134_s27, %s4130_s9 }
 0x59b   : > { %p4132_p0 = pnand %p4131_p13, %p4998_p1 }
 0x59c   : > { %p4137_p12 = por %p4136_p4, %p4135_p3 }
 0x59d   : > { %p4133_p2 = pneg %p4132_p0 }
 0x59f   : > { %p4138_p9 = pnand %p4137_p12, %p4133_p2 }
 0x5a1   : > { %4141 = shalt.err (!%p4138_p9)
}
 0x5a2   : > { %3498 = dma.vmem_to_hbm [thread:$0]  (%p4998_p1), %s4836_s4, 256, %s4834_s7, %s2899_s29  }
 0x5a3 PF: > { %p3543_p11 = scmp.ge.s32.totalorder %s4276_s30, 2  ;;  %s2927_s25 = sand.u32 1, %s4224_s17  }
 0x5a4   : > { %p4999_p7 = scmp.ne.s32.totalorder %s4981_s11, 0  ;;  %s2928_s0 = scalar_lea.sflag [#allocation5], %s2927_s25 }
 0x5a6   : > { %p3527_p5 = pnand %p3543_p11, %p4999_p7 }
 0x5a8   : > { %p3528_p8 = pneg %p3527_p5 }
 0x5aa   : > { %4219 = dma.done.wait (%p3528_p8), %s2928_s0, 256  }
 0x5ab   : > { %4221 = vsyncadd (%p3528_p8), %s2928_s0, 4294967040  ;;  %s33_s30 = sadd.s32 1, %s4276_s30   ;;  %s5001_s23 = sld [smem:[#allocation24_spill]] }
 0x5ac   : > { %p4866_p10 = scmp.ge.s32.totalorder %s33_s30, 8   ;;  %s5002_s22 = sld [smem:[#allocation32_spill]] }
 0x5ad   : > { %s5003_s13 = sld [smem:[#allocation25_spill]]  ;;  %s5008_s17 = smov %s4228_s18 }
 0x5ae   : > { %s5004_s25 = sld [smem:[#allocation33_spill]]  ;;  %s5009_s18 = smov %s4232_s19 }
 0x5af   : > { %s5005_s27 = sld [smem:[#allocation28_spill]]  ;;  %s5010_s19 = smov %s4560_s12 }
 0x5b0   : > { %s5006_s11 = sld [smem:[#allocation30_spill]]  ;;  %s5011_s20 = smov %s4240_s21 }
 0x5b1   : > { %s5007_s29 = sld [smem:[#allocation31_spill]]  ;;  %s5012_s21 = smov %s5001_s23 }
 0x5b2   : > { %s5013_s23 = smov %s4252_s24  ;;  %s5015_s26 = smov %s4268_s28 }
 0x5b3   : > { %s5014_s24 = smov %s5003_s13  ;;  %32 = sbr.rel (!%p4866_p10) target bundleno = 28 (0x1c), region = 153 }
 0x5b6   : > { %s5016_s28 = smov %s5006_s11 }
 0x5b8   :  { %2933 = vsyncpa [#allocation4], 1 }
 0x5b9   :  { %2935 = vsyncpa [#allocation4 + $0x1], 1 }
 0x5ba   :  { %2936 = vsyncpa [#allocation7], 1 }
 0x5bb   :  { %2937 = vsyncpa [#allocation10], 1 }
 0x5bc   :  { %2938 = vsyncpa [#allocation13], 1 }
 0x5bd   :  { %2939 = vsyncpa [#allocation16], 1 }
 0x5be   :  { %2941 = vsyncpa [#allocation16 + $0x1], 1 }
 0x5bf   :  { %2942 = vsyncpa [#allocation5], 1 }
 0x5c0   :  { %2944 = vsyncpa [#allocation5 + $0x1], 1 }

</bundles_post_ra>
